<compile_context>
chip_gen: v7x
topology: tpu7x:2x2x1
jax: 0.10.0
libtpu: 0.0.40
codegen_flags: <defaults>
</compile_context>

<pallas_src>
import jax
import jax.numpy as jnp
from jax.experimental import pallas as pl
from jax.experimental.pallas import tpu as pltpu


def lstm_classifier_kernel(x_ref, wih0_ref, b0_ref, whh0_ref,
                           wih1_ref, whh1_ref, b1_ref,
                           w1h_ref, bh1_ref, w2h_ref, bh2_ref,
                           out_ref):
    # x_ref:    (seq*batch, D)   time-major flattened input (row t*batch + b)
    # wih0_ref: (D, 4H)          b0_ref: (1, 4H)
    # whh0_ref: (H, 4H)
    # wih1_ref: (H, 4H)          whh1_ref: (H, 4H)   b1_ref: (1, 4H)
    # w1h_ref:  (H, 50)          bh1_ref: (1, 50)
    # w2h_ref:  (50, 5)          bh2_ref: (1, 5)
    # out_ref:  (2*batch, 5)     rows [layer0 x batch ; layer1 x batch]
    n_out = out_ref.shape[1]
    batch = out_ref.shape[0] // 2
    seq = x_ref.shape[0] // batch
    H = whh0_ref.shape[0]

    wih0 = wih0_ref[...]
    b0 = b0_ref[...]
    whh0 = whh0_ref[...]
    wih1 = wih1_ref[...]
    whh1 = whh1_ref[...]
    b1 = b1_ref[...]

    # Off the recurrence chain: layer-0 input projection for ALL timesteps
    # in a single MXU pass (time-major, so per-step rows are contiguous).
    xp = jnp.dot(x_ref[...], wih0, preferred_element_type=jnp.float32) + b0  # (seq*batch, 4H)

    def gates_to_hc(gates, c):
        # One sigmoid + one tanh over the full (batch, 4H) vreg (2 EUP passes),
        # then static lane slices for the i/f/g/o segments (PyTorch order).
        sg = jax.nn.sigmoid(gates)
        th = jnp.tanh(gates)
        i = sg[:, 0:H]
        f = sg[:, H:2 * H]
        g = th[:, 2 * H:3 * H]
        o = sg[:, 3 * H:4 * H]
        c_new = f * c + i * g
        h_new = o * jnp.tanh(c_new)
        return h_new, c_new

    zeros = jnp.zeros((batch, H), jnp.float32)
    h0, c0, h1, c1 = zeros, zeros, zeros, zeros

    # Fully unrolled recurrence; all state is carried in vregs.
    for t in range(seq):
        # Layer 0: only the hidden-state dot is on the serial path.
        g0 = xp[t * batch:(t + 1) * batch, :] + jnp.dot(
            h0, whh0, preferred_element_type=jnp.float32)
        h0, c0 = gates_to_hc(g0, c0)
        # Layer 1: split dot -> dot(h1_prev, whh1) only depends on the previous
        # step and can overlap layer-0's activation math.
        g1 = (jnp.dot(h0, wih1, preferred_element_type=jnp.float32)
              + jnp.dot(h1, whh1, preferred_element_type=jnp.float32)
              + b1)
        h1, c1 = gates_to_hc(g1, c1)

    # MLP head on both layers' final hidden states: sublane-stack to
    # (2*batch, H) and run the plain head weights (2 small dots total).
    hh = jnp.concatenate([h0, h1], axis=0)                        # (2*batch, H)
    y = jnp.dot(hh, w1h_ref[...], preferred_element_type=jnp.float32) + bh1_ref[...]
    y = jnp.maximum(y, 0.0)
    z = jnp.dot(y, w2h_ref[...], preferred_element_type=jnp.float32) + bh2_ref[...]
    out_ref[...] = z[:, 0:n_out].astype(out_ref.dtype)


def prep_params(params):
    """One-time weight preprocessing (hoisted out of the per-call path)."""
    return dict(
        wih0_t=params['wih0'].T,                                     # (D, 4H)
        b0=(params['bih0'] + params['bhh0']).reshape(1, -1),         # (1, 4H)
        whh0_t=params['whh0'].T,                                     # (H, 4H)
        wih1_t=params['wih1'].T,                                     # (H, 4H)
        whh1_t=params['whh1'].T,                                     # (H, 4H)
        b1=(params['bih1'] + params['bhh1']).reshape(1, -1),         # (1, 4H)
        w1h=params['w1'].T,                                          # (H, 50)
        bh1=params['b1'].reshape(1, -1),                             # (1, 50)
        w2h=params['w2'].T,                                          # (50, 5)
        bh2=params['b2'].reshape(1, -1),                             # (1, 5)
    )


def classifier_forward(x, prepped):
    """x: (batch, seq, input_dim) float32, like the PyTorch batch_first input."""
    batch, seq, input_dim = x.shape
    n_out = prepped['w2h'].shape[1]

    # Time-major flatten so in-kernel per-step rows are contiguous sublanes.
    x2d = jnp.transpose(x, (1, 0, 2)).reshape(seq * batch, input_dim)

    vmem = pl.BlockSpec(memory_space=pltpu.MemorySpace.VMEM)
    out2d = pl.pallas_call(
        lstm_classifier_kernel,
        out_shape=jax.ShapeDtypeStruct((2 * batch, n_out), jnp.float32),
        in_specs=[vmem] * 11,
        out_specs=vmem,
    )(x2d, prepped['wih0_t'], prepped['b0'], prepped['whh0_t'],
      prepped['wih1_t'], prepped['whh1_t'], prepped['b1'],
      prepped['w1h'], prepped['bh1'], prepped['w2h'], prepped['bh2'])
    return out2d.reshape(2, batch, n_out)     # (num_layers, batch, 5)


def classifier_ref(x, params):
    """Plain-JAX reference reproducing the PyTorch forward exactly."""
    batch, seq, _ = x.shape
    H = params['whh0'].shape[1]

    def cell(x_t, h, c, wih, whh, b):
        gates = x_t @ wih.T + h @ whh.T + b
        i, f, g, o = jnp.split(gates, 4, axis=-1)
        i = jax.nn.sigmoid(i)
        f = jax.nn.sigmoid(f)
        g = jnp.tanh(g)
        o = jax.nn.sigmoid(o)
        c = f * c + i * g
        h = o * jnp.tanh(c)
        return h, c

    h0 = c0 = h1 = c1 = jnp.zeros((batch, H), jnp.float32)
    b0 = params['bih0'] + params['bhh0']
    b1 = params['bih1'] + params['bhh1']
    for t in range(seq):
        h0, c0 = cell(x[:, t, :], h0, c0, params['wih0'], params['whh0'], b0)
        h1, c1 = cell(h0, h1, c1, params['wih1'], params['whh1'], b1)
    hidden = jnp.stack([h0, h1], axis=0)               # (num_layers, batch, H)
    y = jnp.maximum(hidden @ params['w1'].T + params['b1'], 0.0)
    return y @ params['w2'].T + params['b2']


def init_params(key, input_dim, hidden_dim):
    H = hidden_dim
    ks = jax.random.split(key, 12)
    s = 1.0 / jnp.sqrt(H)
    u = lambda k, shape: jax.random.uniform(k, shape, jnp.float32, -s, s)
    return dict(
        wih0=u(ks[0], (4 * H, input_dim)), whh0=u(ks[1], (4 * H, H)),
        bih0=u(ks[2], (4 * H,)), bhh0=u(ks[3], (4 * H,)),
        wih1=u(ks[4], (4 * H, H)), whh1=u(ks[5], (4 * H, H)),
        bih1=u(ks[6], (4 * H,)), bhh1=u(ks[7], (4 * H,)),
        w1=u(ks[8], (50, H)), b1=u(ks[9], (50,)),
        w2=u(ks[10], (5, 50)), b2=u(ks[11], (5,)),
    )


if __name__ == "__main__":
    batch, seq, input_dim, hidden_dim = 2, 8, 16, 32
    key = jax.random.PRNGKey(0)
    k_x, k_p = jax.random.split(key)
    x = jax.random.normal(k_x, (batch, seq, input_dim), jnp.float32)
    params = init_params(k_p, input_dim, hidden_dim)

    prepped = jax.tree_util.tree_map(jax.device_put, prep_params(params))
    fwd = jax.jit(classifier_forward)

    out = jax.block_until_ready(fwd(x, prepped))
    ref = classifier_ref(x, params)
    assert out.shape == (2, batch, 5), out.shape
    assert jnp.allclose(out, ref, atol=1e-4, rtol=1e-4), (out, ref)
    print("KERNEL_OK")
</pallas_src>

<mosaic_0001>
module attributes {stable_mosaic.version = 11 : i64} {
  func.func @lstm_classifier_kernel(%arg0: memref<16x16xf32, #tpu.memory_space<vmem>>, %arg1: memref<16x128xf32, #tpu.memory_space<vmem>>, %arg2: memref<1x128xf32, #tpu.memory_space<vmem>>, %arg3: memref<32x128xf32, #tpu.memory_space<vmem>>, %arg4: memref<32x128xf32, #tpu.memory_space<vmem>>, %arg5: memref<32x128xf32, #tpu.memory_space<vmem>>, %arg6: memref<1x128xf32, #tpu.memory_space<vmem>>, %arg7: memref<32x50xf32, #tpu.memory_space<vmem>>, %arg8: memref<1x50xf32, #tpu.memory_space<vmem>>, %arg9: memref<50x5xf32, #tpu.memory_space<vmem>>, %arg10: memref<1x5xf32, #tpu.memory_space<vmem>>, %arg11: memref<4x5xf32, #tpu.memory_space<vmem>>) attributes {dimension_semantics = [], scalar_prefetch = 0 : i64, scratch_operands = 0 : i64, tpu.core_type = #tpu.core_type<tc>} {
    %c0 = arith.constant 0 : index
    %c0_0 = arith.constant 0 : index
    %0 = vector.load %arg1[%c0, %c0_0] : memref<16x128xf32, #tpu.memory_space<vmem>>, vector<16x128xf32>
    %c0_1 = arith.constant 0 : index
    %c0_2 = arith.constant 0 : index
    %1 = vector.load %arg2[%c0_1, %c0_2] : memref<1x128xf32, #tpu.memory_space<vmem>>, vector<1x128xf32>
    %c0_3 = arith.constant 0 : index
    %c0_4 = arith.constant 0 : index
    %2 = vector.load %arg3[%c0_3, %c0_4] : memref<32x128xf32, #tpu.memory_space<vmem>>, vector<32x128xf32>
    %c0_5 = arith.constant 0 : index
    %c0_6 = arith.constant 0 : index
    %3 = vector.load %arg4[%c0_5, %c0_6] : memref<32x128xf32, #tpu.memory_space<vmem>>, vector<32x128xf32>
    %c0_7 = arith.constant 0 : index
    %c0_8 = arith.constant 0 : index
    %4 = vector.load %arg5[%c0_7, %c0_8] : memref<32x128xf32, #tpu.memory_space<vmem>>, vector<32x128xf32>
    %c0_9 = arith.constant 0 : index
    %c0_10 = arith.constant 0 : index
    %5 = vector.load %arg6[%c0_9, %c0_10] : memref<1x128xf32, #tpu.memory_space<vmem>>, vector<1x128xf32>
    %c0_11 = arith.constant 0 : index
    %c0_12 = arith.constant 0 : index
    %6 = vector.load %arg0[%c0_11, %c0_12] : memref<16x16xf32, #tpu.memory_space<vmem>>, vector<16x16xf32>
    %cst = arith.constant dense<0.000000e+00> : vector<16x128xf32>
    %7 = tpu.matmul %6, %0, %cst {dimension_numbers = #tpu.dot_dimension_numbers<[1], [0], [0], [1], [0, 0, 1, 1], [], []>} : vector<16x16xf32>, vector<16x128xf32>, vector<16x128xf32> -> vector<16x128xf32>
    %8 = vector.broadcast %1 : vector<1x128xf32> to vector<16x128xf32>
    %9 = arith.addf %7, %8 : vector<16x128xf32>
    %cst_13 = arith.constant 0.000000e+00 : f32
    %10 = vector.broadcast %cst_13 : f32 to vector<2x32xf32>
    %11 = vector.extract_strided_slice %9 {offsets = [0, 0], sizes = [2, 128], strides = [1, 1]} : vector<16x128xf32> to vector<2x128xf32>
    %cst_14 = arith.constant dense<0.000000e+00> : vector<2x128xf32>
    %12 = tpu.matmul %10, %2, %cst_14 {dimension_numbers = #tpu.dot_dimension_numbers<[1], [0], [0], [1], [0, 0, 1, 1], [], []>} : vector<2x32xf32>, vector<32x128xf32>, vector<2x128xf32> -> vector<2x128xf32>
    %13 = arith.addf %11, %12 : vector<2x128xf32>
    %14 = arith.negf %13 : vector<2x128xf32>
    %15 = math.exp %14 : vector<2x128xf32>
    %cst_15 = arith.constant 1.000000e+00 : f32
    %16 = vector.broadcast %cst_15 : f32 to vector<2x128xf32>
    %17 = arith.addf %16, %15 : vector<2x128xf32>
    %18 = arith.divf %16, %17 : vector<2x128xf32>
    %19 = math.tanh %13 : vector<2x128xf32>
    %20 = vector.extract_strided_slice %18 {offsets = [0, 0], sizes = [2, 32], strides = [1, 1]} : vector<2x128xf32> to vector<2x32xf32>
    %21 = vector.extract_strided_slice %18 {offsets = [0, 32], sizes = [2, 32], strides = [1, 1]} : vector<2x128xf32> to vector<2x32xf32>
    %22 = vector.extract_strided_slice %19 {offsets = [0, 64], sizes = [2, 32], strides = [1, 1]} : vector<2x128xf32> to vector<2x32xf32>
    %23 = vector.extract_strided_slice %18 {offsets = [0, 96], sizes = [2, 32], strides = [1, 1]} : vector<2x128xf32> to vector<2x32xf32>
    %24 = arith.mulf %21, %10 : vector<2x32xf32>
    %25 = arith.mulf %20, %22 : vector<2x32xf32>
    %26 = arith.addf %24, %25 : vector<2x32xf32>
    %27 = math.tanh %26 : vector<2x32xf32>
    %28 = arith.mulf %23, %27 : vector<2x32xf32>
    %cst_16 = arith.constant dense<0.000000e+00> : vector<2x128xf32>
    %29 = tpu.matmul %28, %3, %cst_16 {dimension_numbers = #tpu.dot_dimension_numbers<[1], [0], [0], [1], [0, 0, 1, 1], [], []>} : vector<2x32xf32>, vector<32x128xf32>, vector<2x128xf32> -> vector<2x128xf32>
    %cst_17 = arith.constant dense<0.000000e+00> : vector<2x128xf32>
    %30 = tpu.matmul %10, %4, %cst_17 {dimension_numbers = #tpu.dot_dimension_numbers<[1], [0], [0], [1], [0, 0, 1, 1], [], []>} : vector<2x32xf32>, vector<32x128xf32>, vector<2x128xf32> -> vector<2x128xf32>
    %31 = arith.addf %29, %30 : vector<2x128xf32>
    %32 = vector.broadcast %5 : vector<1x128xf32> to vector<2x128xf32>
    %33 = arith.addf %31, %32 : vector<2x128xf32>
    %34 = arith.negf %33 : vector<2x128xf32>
    %35 = math.exp %34 : vector<2x128xf32>
    %cst_18 = arith.constant 1.000000e+00 : f32
    %36 = vector.broadcast %cst_18 : f32 to vector<2x128xf32>
    %37 = arith.addf %36, %35 : vector<2x128xf32>
    %38 = arith.divf %36, %37 : vector<2x128xf32>
    %39 = math.tanh %33 : vector<2x128xf32>
    %40 = vector.extract_strided_slice %38 {offsets = [0, 0], sizes = [2, 32], strides = [1, 1]} : vector<2x128xf32> to vector<2x32xf32>
    %41 = vector.extract_strided_slice %38 {offsets = [0, 32], sizes = [2, 32], strides = [1, 1]} : vector<2x128xf32> to vector<2x32xf32>
    %42 = vector.extract_strided_slice %39 {offsets = [0, 64], sizes = [2, 32], strides = [1, 1]} : vector<2x128xf32> to vector<2x32xf32>
    %43 = vector.extract_strided_slice %38 {offsets = [0, 96], sizes = [2, 32], strides = [1, 1]} : vector<2x128xf32> to vector<2x32xf32>
    %44 = arith.mulf %41, %10 : vector<2x32xf32>
    %45 = arith.mulf %40, %42 : vector<2x32xf32>
    %46 = arith.addf %44, %45 : vector<2x32xf32>
    %47 = math.tanh %46 : vector<2x32xf32>
    %48 = arith.mulf %43, %47 : vector<2x32xf32>
    %49 = vector.extract_strided_slice %9 {offsets = [2, 0], sizes = [2, 128], strides = [1, 1]} : vector<16x128xf32> to vector<2x128xf32>
    %cst_19 = arith.constant dense<0.000000e+00> : vector<2x128xf32>
    %50 = tpu.matmul %28, %2, %cst_19 {dimension_numbers = #tpu.dot_dimension_numbers<[1], [0], [0], [1], [0, 0, 1, 1], [], []>} : vector<2x32xf32>, vector<32x128xf32>, vector<2x128xf32> -> vector<2x128xf32>
    %51 = arith.addf %49, %50 : vector<2x128xf32>
    %52 = arith.negf %51 : vector<2x128xf32>
    %53 = math.exp %52 : vector<2x128xf32>
    %cst_20 = arith.constant 1.000000e+00 : f32
    %54 = vector.broadcast %cst_20 : f32 to vector<2x128xf32>
    %55 = arith.addf %54, %53 : vector<2x128xf32>
    %56 = arith.divf %54, %55 : vector<2x128xf32>
    %57 = math.tanh %51 : vector<2x128xf32>
    %58 = vector.extract_strided_slice %56 {offsets = [0, 0], sizes = [2, 32], strides = [1, 1]} : vector<2x128xf32> to vector<2x32xf32>
    %59 = vector.extract_strided_slice %56 {offsets = [0, 32], sizes = [2, 32], strides = [1, 1]} : vector<2x128xf32> to vector<2x32xf32>
    %60 = vector.extract_strided_slice %57 {offsets = [0, 64], sizes = [2, 32], strides = [1, 1]} : vector<2x128xf32> to vector<2x32xf32>
    %61 = vector.extract_strided_slice %56 {offsets = [0, 96], sizes = [2, 32], strides = [1, 1]} : vector<2x128xf32> to vector<2x32xf32>
    %62 = arith.mulf %59, %26 : vector<2x32xf32>
    %63 = arith.mulf %58, %60 : vector<2x32xf32>
    %64 = arith.addf %62, %63 : vector<2x32xf32>
    %65 = math.tanh %64 : vector<2x32xf32>
    %66 = arith.mulf %61, %65 : vector<2x32xf32>
    %cst_21 = arith.constant dense<0.000000e+00> : vector<2x128xf32>
    %67 = tpu.matmul %66, %3, %cst_21 {dimension_numbers = #tpu.dot_dimension_numbers<[1], [0], [0], [1], [0, 0, 1, 1], [], []>} : vector<2x32xf32>, vector<32x128xf32>, vector<2x128xf32> -> vector<2x128xf32>
    %cst_22 = arith.constant dense<0.000000e+00> : vector<2x128xf32>
    %68 = tpu.matmul %48, %4, %cst_22 {dimension_numbers = #tpu.dot_dimension_numbers<[1], [0], [0], [1], [0, 0, 1, 1], [], []>} : vector<2x32xf32>, vector<32x128xf32>, vector<2x128xf32> -> vector<2x128xf32>
    %69 = arith.addf %67, %68 : vector<2x128xf32>
    %70 = vector.broadcast %5 : vector<1x128xf32> to vector<2x128xf32>
    %71 = arith.addf %69, %70 : vector<2x128xf32>
    %72 = arith.negf %71 : vector<2x128xf32>
    %73 = math.exp %72 : vector<2x128xf32>
    %cst_23 = arith.constant 1.000000e+00 : f32
    %74 = vector.broadcast %cst_23 : f32 to vector<2x128xf32>
    %75 = arith.addf %74, %73 : vector<2x128xf32>
    %76 = arith.divf %74, %75 : vector<2x128xf32>
    %77 = math.tanh %71 : vector<2x128xf32>
    %78 = vector.extract_strided_slice %76 {offsets = [0, 0], sizes = [2, 32], strides = [1, 1]} : vector<2x128xf32> to vector<2x32xf32>
    %79 = vector.extract_strided_slice %76 {offsets = [0, 32], sizes = [2, 32], strides = [1, 1]} : vector<2x128xf32> to vector<2x32xf32>
    %80 = vector.extract_strided_slice %77 {offsets = [0, 64], sizes = [2, 32], strides = [1, 1]} : vector<2x128xf32> to vector<2x32xf32>
    %81 = vector.extract_strided_slice %76 {offsets = [0, 96], sizes = [2, 32], strides = [1, 1]} : vector<2x128xf32> to vector<2x32xf32>
    %82 = arith.mulf %79, %46 : vector<2x32xf32>
    %83 = arith.mulf %78, %80 : vector<2x32xf32>
    %84 = arith.addf %82, %83 : vector<2x32xf32>
    %85 = math.tanh %84 : vector<2x32xf32>
    %86 = arith.mulf %81, %85 : vector<2x32xf32>
    %87 = vector.extract_strided_slice %9 {offsets = [4, 0], sizes = [2, 128], strides = [1, 1]} : vector<16x128xf32> to vector<2x128xf32>
    %cst_24 = arith.constant dense<0.000000e+00> : vector<2x128xf32>
    %88 = tpu.matmul %66, %2, %cst_24 {dimension_numbers = #tpu.dot_dimension_numbers<[1], [0], [0], [1], [0, 0, 1, 1], [], []>} : vector<2x32xf32>, vector<32x128xf32>, vector<2x128xf32> -> vector<2x128xf32>
    %89 = arith.addf %87, %88 : vector<2x128xf32>
    %90 = arith.negf %89 : vector<2x128xf32>
    %91 = math.exp %90 : vector<2x128xf32>
    %cst_25 = arith.constant 1.000000e+00 : f32
    %92 = vector.broadcast %cst_25 : f32 to vector<2x128xf32>
    %93 = arith.addf %92, %91 : vector<2x128xf32>
    %94 = arith.divf %92, %93 : vector<2x128xf32>
    %95 = math.tanh %89 : vector<2x128xf32>
    %96 = vector.extract_strided_slice %94 {offsets = [0, 0], sizes = [2, 32], strides = [1, 1]} : vector<2x128xf32> to vector<2x32xf32>
    %97 = vector.extract_strided_slice %94 {offsets = [0, 32], sizes = [2, 32], strides = [1, 1]} : vector<2x128xf32> to vector<2x32xf32>
    %98 = vector.extract_strided_slice %95 {offsets = [0, 64], sizes = [2, 32], strides = [1, 1]} : vector<2x128xf32> to vector<2x32xf32>
    %99 = vector.extract_strided_slice %94 {offsets = [0, 96], sizes = [2, 32], strides = [1, 1]} : vector<2x128xf32> to vector<2x32xf32>
    %100 = arith.mulf %97, %64 : vector<2x32xf32>
    %101 = arith.mulf %96, %98 : vector<2x32xf32>
    %102 = arith.addf %100, %101 : vector<2x32xf32>
    %103 = math.tanh %102 : vector<2x32xf32>
    %104 = arith.mulf %99, %103 : vector<2x32xf32>
    %cst_26 = arith.constant dense<0.000000e+00> : vector<2x128xf32>
    %105 = tpu.matmul %104, %3, %cst_26 {dimension_numbers = #tpu.dot_dimension_numbers<[1], [0], [0], [1], [0, 0, 1, 1], [], []>} : vector<2x32xf32>, vector<32x128xf32>, vector<2x128xf32> -> vector<2x128xf32>
    %cst_27 = arith.constant dense<0.000000e+00> : vector<2x128xf32>
    %106 = tpu.matmul %86, %4, %cst_27 {dimension_numbers = #tpu.dot_dimension_numbers<[1], [0], [0], [1], [0, 0, 1, 1], [], []>} : vector<2x32xf32>, vector<32x128xf32>, vector<2x128xf32> -> vector<2x128xf32>
    %107 = arith.addf %105, %106 : vector<2x128xf32>
    %108 = vector.broadcast %5 : vector<1x128xf32> to vector<2x128xf32>
    %109 = arith.addf %107, %108 : vector<2x128xf32>
    %110 = arith.negf %109 : vector<2x128xf32>
    %111 = math.exp %110 : vector<2x128xf32>
    %cst_28 = arith.constant 1.000000e+00 : f32
    %112 = vector.broadcast %cst_28 : f32 to vector<2x128xf32>
    %113 = arith.addf %112, %111 : vector<2x128xf32>
    %114 = arith.divf %112, %113 : vector<2x128xf32>
    %115 = math.tanh %109 : vector<2x128xf32>
    %116 = vector.extract_strided_slice %114 {offsets = [0, 0], sizes = [2, 32], strides = [1, 1]} : vector<2x128xf32> to vector<2x32xf32>
    %117 = vector.extract_strided_slice %114 {offsets = [0, 32], sizes = [2, 32], strides = [1, 1]} : vector<2x128xf32> to vector<2x32xf32>
    %118 = vector.extract_strided_slice %115 {offsets = [0, 64], sizes = [2, 32], strides = [1, 1]} : vector<2x128xf32> to vector<2x32xf32>
    %119 = vector.extract_strided_slice %114 {offsets = [0, 96], sizes = [2, 32], strides = [1, 1]} : vector<2x128xf32> to vector<2x32xf32>
    %120 = arith.mulf %117, %84 : vector<2x32xf32>
    %121 = arith.mulf %116, %118 : vector<2x32xf32>
    %122 = arith.addf %120, %121 : vector<2x32xf32>
    %123 = math.tanh %122 : vector<2x32xf32>
    %124 = arith.mulf %119, %123 : vector<2x32xf32>
    %125 = vector.extract_strided_slice %9 {offsets = [6, 0], sizes = [2, 128], strides = [1, 1]} : vector<16x128xf32> to vector<2x128xf32>
    %cst_29 = arith.constant dense<0.000000e+00> : vector<2x128xf32>
    %126 = tpu.matmul %104, %2, %cst_29 {dimension_numbers = #tpu.dot_dimension_numbers<[1], [0], [0], [1], [0, 0, 1, 1], [], []>} : vector<2x32xf32>, vector<32x128xf32>, vector<2x128xf32> -> vector<2x128xf32>
    %127 = arith.addf %125, %126 : vector<2x128xf32>
    %128 = arith.negf %127 : vector<2x128xf32>
    %129 = math.exp %128 : vector<2x128xf32>
    %cst_30 = arith.constant 1.000000e+00 : f32
    %130 = vector.broadcast %cst_30 : f32 to vector<2x128xf32>
    %131 = arith.addf %130, %129 : vector<2x128xf32>
    %132 = arith.divf %130, %131 : vector<2x128xf32>
    %133 = math.tanh %127 : vector<2x128xf32>
    %134 = vector.extract_strided_slice %132 {offsets = [0, 0], sizes = [2, 32], strides = [1, 1]} : vector<2x128xf32> to vector<2x32xf32>
    %135 = vector.extract_strided_slice %132 {offsets = [0, 32], sizes = [2, 32], strides = [1, 1]} : vector<2x128xf32> to vector<2x32xf32>
    %136 = vector.extract_strided_slice %133 {offsets = [0, 64], sizes = [2, 32], strides = [1, 1]} : vector<2x128xf32> to vector<2x32xf32>
    %137 = vector.extract_strided_slice %132 {offsets = [0, 96], sizes = [2, 32], strides = [1, 1]} : vector<2x128xf32> to vector<2x32xf32>
    %138 = arith.mulf %135, %102 : vector<2x32xf32>
    %139 = arith.mulf %134, %136 : vector<2x32xf32>
    %140 = arith.addf %138, %139 : vector<2x32xf32>
    %141 = math.tanh %140 : vector<2x32xf32>
    %142 = arith.mulf %137, %141 : vector<2x32xf32>
    %cst_31 = arith.constant dense<0.000000e+00> : vector<2x128xf32>
    %143 = tpu.matmul %142, %3, %cst_31 {dimension_numbers = #tpu.dot_dimension_numbers<[1], [0], [0], [1], [0, 0, 1, 1], [], []>} : vector<2x32xf32>, vector<32x128xf32>, vector<2x128xf32> -> vector<2x128xf32>
    %cst_32 = arith.constant dense<0.000000e+00> : vector<2x128xf32>
    %144 = tpu.matmul %124, %4, %cst_32 {dimension_numbers = #tpu.dot_dimension_numbers<[1], [0], [0], [1], [0, 0, 1, 1], [], []>} : vector<2x32xf32>, vector<32x128xf32>, vector<2x128xf32> -> vector<2x128xf32>
    %145 = arith.addf %143, %144 : vector<2x128xf32>
    %146 = vector.broadcast %5 : vector<1x128xf32> to vector<2x128xf32>
    %147 = arith.addf %145, %146 : vector<2x128xf32>
    %148 = arith.negf %147 : vector<2x128xf32>
    %149 = math.exp %148 : vector<2x128xf32>
    %cst_33 = arith.constant 1.000000e+00 : f32
    %150 = vector.broadcast %cst_33 : f32 to vector<2x128xf32>
    %151 = arith.addf %150, %149 : vector<2x128xf32>
    %152 = arith.divf %150, %151 : vector<2x128xf32>
    %153 = math.tanh %147 : vector<2x128xf32>
    %154 = vector.extract_strided_slice %152 {offsets = [0, 0], sizes = [2, 32], strides = [1, 1]} : vector<2x128xf32> to vector<2x32xf32>
    %155 = vector.extract_strided_slice %152 {offsets = [0, 32], sizes = [2, 32], strides = [1, 1]} : vector<2x128xf32> to vector<2x32xf32>
    %156 = vector.extract_strided_slice %153 {offsets = [0, 64], sizes = [2, 32], strides = [1, 1]} : vector<2x128xf32> to vector<2x32xf32>
    %157 = vector.extract_strided_slice %152 {offsets = [0, 96], sizes = [2, 32], strides = [1, 1]} : vector<2x128xf32> to vector<2x32xf32>
    %158 = arith.mulf %155, %122 : vector<2x32xf32>
    %159 = arith.mulf %154, %156 : vector<2x32xf32>
    %160 = arith.addf %158, %159 : vector<2x32xf32>
    %161 = math.tanh %160 : vector<2x32xf32>
    %162 = arith.mulf %157, %161 : vector<2x32xf32>
    %163 = vector.extract_strided_slice %9 {offsets = [8, 0], sizes = [2, 128], strides = [1, 1]} : vector<16x128xf32> to vector<2x128xf32>
    %cst_34 = arith.constant dense<0.000000e+00> : vector<2x128xf32>
    %164 = tpu.matmul %142, %2, %cst_34 {dimension_numbers = #tpu.dot_dimension_numbers<[1], [0], [0], [1], [0, 0, 1, 1], [], []>} : vector<2x32xf32>, vector<32x128xf32>, vector<2x128xf32> -> vector<2x128xf32>
    %165 = arith.addf %163, %164 : vector<2x128xf32>
    %166 = arith.negf %165 : vector<2x128xf32>
    %167 = math.exp %166 : vector<2x128xf32>
    %cst_35 = arith.constant 1.000000e+00 : f32
    %168 = vector.broadcast %cst_35 : f32 to vector<2x128xf32>
    %169 = arith.addf %168, %167 : vector<2x128xf32>
    %170 = arith.divf %168, %169 : vector<2x128xf32>
    %171 = math.tanh %165 : vector<2x128xf32>
    %172 = vector.extract_strided_slice %170 {offsets = [0, 0], sizes = [2, 32], strides = [1, 1]} : vector<2x128xf32> to vector<2x32xf32>
    %173 = vector.extract_strided_slice %170 {offsets = [0, 32], sizes = [2, 32], strides = [1, 1]} : vector<2x128xf32> to vector<2x32xf32>
    %174 = vector.extract_strided_slice %171 {offsets = [0, 64], sizes = [2, 32], strides = [1, 1]} : vector<2x128xf32> to vector<2x32xf32>
    %175 = vector.extract_strided_slice %170 {offsets = [0, 96], sizes = [2, 32], strides = [1, 1]} : vector<2x128xf32> to vector<2x32xf32>
    %176 = arith.mulf %173, %140 : vector<2x32xf32>
    %177 = arith.mulf %172, %174 : vector<2x32xf32>
    %178 = arith.addf %176, %177 : vector<2x32xf32>
    %179 = math.tanh %178 : vector<2x32xf32>
    %180 = arith.mulf %175, %179 : vector<2x32xf32>
    %cst_36 = arith.constant dense<0.000000e+00> : vector<2x128xf32>
    %181 = tpu.matmul %180, %3, %cst_36 {dimension_numbers = #tpu.dot_dimension_numbers<[1], [0], [0], [1], [0, 0, 1, 1], [], []>} : vector<2x32xf32>, vector<32x128xf32>, vector<2x128xf32> -> vector<2x128xf32>
    %cst_37 = arith.constant dense<0.000000e+00> : vector<2x128xf32>
    %182 = tpu.matmul %162, %4, %cst_37 {dimension_numbers = #tpu.dot_dimension_numbers<[1], [0], [0], [1], [0, 0, 1, 1], [], []>} : vector<2x32xf32>, vector<32x128xf32>, vector<2x128xf32> -> vector<2x128xf32>
    %183 = arith.addf %181, %182 : vector<2x128xf32>
    %184 = vector.broadcast %5 : vector<1x128xf32> to vector<2x128xf32>
    %185 = arith.addf %183, %184 : vector<2x128xf32>
    %186 = arith.negf %185 : vector<2x128xf32>
    %187 = math.exp %186 : vector<2x128xf32>
    %cst_38 = arith.constant 1.000000e+00 : f32
    %188 = vector.broadcast %cst_38 : f32 to vector<2x128xf32>
    %189 = arith.addf %188, %187 : vector<2x128xf32>
    %190 = arith.divf %188, %189 : vector<2x128xf32>
    %191 = math.tanh %185 : vector<2x128xf32>
    %192 = vector.extract_strided_slice %190 {offsets = [0, 0], sizes = [2, 32], strides = [1, 1]} : vector<2x128xf32> to vector<2x32xf32>
    %193 = vector.extract_strided_slice %190 {offsets = [0, 32], sizes = [2, 32], strides = [1, 1]} : vector<2x128xf32> to vector<2x32xf32>
    %194 = vector.extract_strided_slice %191 {offsets = [0, 64], sizes = [2, 32], strides = [1, 1]} : vector<2x128xf32> to vector<2x32xf32>
    %195 = vector.extract_strided_slice %190 {offsets = [0, 96], sizes = [2, 32], strides = [1, 1]} : vector<2x128xf32> to vector<2x32xf32>
    %196 = arith.mulf %193, %160 : vector<2x32xf32>
    %197 = arith.mulf %192, %194 : vector<2x32xf32>
    %198 = arith.addf %196, %197 : vector<2x32xf32>
    %199 = math.tanh %198 : vector<2x32xf32>
    %200 = arith.mulf %195, %199 : vector<2x32xf32>
    %201 = vector.extract_strided_slice %9 {offsets = [10, 0], sizes = [2, 128], strides = [1, 1]} : vector<16x128xf32> to vector<2x128xf32>
    %cst_39 = arith.constant dense<0.000000e+00> : vector<2x128xf32>
    %202 = tpu.matmul %180, %2, %cst_39 {dimension_numbers = #tpu.dot_dimension_numbers<[1], [0], [0], [1], [0, 0, 1, 1], [], []>} : vector<2x32xf32>, vector<32x128xf32>, vector<2x128xf32> -> vector<2x128xf32>
    %203 = arith.addf %201, %202 : vector<2x128xf32>
    %204 = arith.negf %203 : vector<2x128xf32>
    %205 = math.exp %204 : vector<2x128xf32>
    %cst_40 = arith.constant 1.000000e+00 : f32
    %206 = vector.broadcast %cst_40 : f32 to vector<2x128xf32>
    %207 = arith.addf %206, %205 : vector<2x128xf32>
    %208 = arith.divf %206, %207 : vector<2x128xf32>
    %209 = math.tanh %203 : vector<2x128xf32>
    %210 = vector.extract_strided_slice %208 {offsets = [0, 0], sizes = [2, 32], strides = [1, 1]} : vector<2x128xf32> to vector<2x32xf32>
    %211 = vector.extract_strided_slice %208 {offsets = [0, 32], sizes = [2, 32], strides = [1, 1]} : vector<2x128xf32> to vector<2x32xf32>
    %212 = vector.extract_strided_slice %209 {offsets = [0, 64], sizes = [2, 32], strides = [1, 1]} : vector<2x128xf32> to vector<2x32xf32>
    %213 = vector.extract_strided_slice %208 {offsets = [0, 96], sizes = [2, 32], strides = [1, 1]} : vector<2x128xf32> to vector<2x32xf32>
    %214 = arith.mulf %211, %178 : vector<2x32xf32>
    %215 = arith.mulf %210, %212 : vector<2x32xf32>
    %216 = arith.addf %214, %215 : vector<2x32xf32>
    %217 = math.tanh %216 : vector<2x32xf32>
    %218 = arith.mulf %213, %217 : vector<2x32xf32>
    %cst_41 = arith.constant dense<0.000000e+00> : vector<2x128xf32>
    %219 = tpu.matmul %218, %3, %cst_41 {dimension_numbers = #tpu.dot_dimension_numbers<[1], [0], [0], [1], [0, 0, 1, 1], [], []>} : vector<2x32xf32>, vector<32x128xf32>, vector<2x128xf32> -> vector<2x128xf32>
    %cst_42 = arith.constant dense<0.000000e+00> : vector<2x128xf32>
    %220 = tpu.matmul %200, %4, %cst_42 {dimension_numbers = #tpu.dot_dimension_numbers<[1], [0], [0], [1], [0, 0, 1, 1], [], []>} : vector<2x32xf32>, vector<32x128xf32>, vector<2x128xf32> -> vector<2x128xf32>
    %221 = arith.addf %219, %220 : vector<2x128xf32>
    %222 = vector.broadcast %5 : vector<1x128xf32> to vector<2x128xf32>
    %223 = arith.addf %221, %222 : vector<2x128xf32>
    %224 = arith.negf %223 : vector<2x128xf32>
    %225 = math.exp %224 : vector<2x128xf32>
    %cst_43 = arith.constant 1.000000e+00 : f32
    %226 = vector.broadcast %cst_43 : f32 to vector<2x128xf32>
    %227 = arith.addf %226, %225 : vector<2x128xf32>
    %228 = arith.divf %226, %227 : vector<2x128xf32>
    %229 = math.tanh %223 : vector<2x128xf32>
    %230 = vector.extract_strided_slice %228 {offsets = [0, 0], sizes = [2, 32], strides = [1, 1]} : vector<2x128xf32> to vector<2x32xf32>
    %231 = vector.extract_strided_slice %228 {offsets = [0, 32], sizes = [2, 32], strides = [1, 1]} : vector<2x128xf32> to vector<2x32xf32>
    %232 = vector.extract_strided_slice %229 {offsets = [0, 64], sizes = [2, 32], strides = [1, 1]} : vector<2x128xf32> to vector<2x32xf32>
    %233 = vector.extract_strided_slice %228 {offsets = [0, 96], sizes = [2, 32], strides = [1, 1]} : vector<2x128xf32> to vector<2x32xf32>
    %234 = arith.mulf %231, %198 : vector<2x32xf32>
    %235 = arith.mulf %230, %232 : vector<2x32xf32>
    %236 = arith.addf %234, %235 : vector<2x32xf32>
    %237 = math.tanh %236 : vector<2x32xf32>
    %238 = arith.mulf %233, %237 : vector<2x32xf32>
    %239 = vector.extract_strided_slice %9 {offsets = [12, 0], sizes = [2, 128], strides = [1, 1]} : vector<16x128xf32> to vector<2x128xf32>
    %cst_44 = arith.constant dense<0.000000e+00> : vector<2x128xf32>
    %240 = tpu.matmul %218, %2, %cst_44 {dimension_numbers = #tpu.dot_dimension_numbers<[1], [0], [0], [1], [0, 0, 1, 1], [], []>} : vector<2x32xf32>, vector<32x128xf32>, vector<2x128xf32> -> vector<2x128xf32>
    %241 = arith.addf %239, %240 : vector<2x128xf32>
    %242 = arith.negf %241 : vector<2x128xf32>
    %243 = math.exp %242 : vector<2x128xf32>
    %cst_45 = arith.constant 1.000000e+00 : f32
    %244 = vector.broadcast %cst_45 : f32 to vector<2x128xf32>
    %245 = arith.addf %244, %243 : vector<2x128xf32>
    %246 = arith.divf %244, %245 : vector<2x128xf32>
    %247 = math.tanh %241 : vector<2x128xf32>
    %248 = vector.extract_strided_slice %246 {offsets = [0, 0], sizes = [2, 32], strides = [1, 1]} : vector<2x128xf32> to vector<2x32xf32>
    %249 = vector.extract_strided_slice %246 {offsets = [0, 32], sizes = [2, 32], strides = [1, 1]} : vector<2x128xf32> to vector<2x32xf32>
    %250 = vector.extract_strided_slice %247 {offsets = [0, 64], sizes = [2, 32], strides = [1, 1]} : vector<2x128xf32> to vector<2x32xf32>
    %251 = vector.extract_strided_slice %246 {offsets = [0, 96], sizes = [2, 32], strides = [1, 1]} : vector<2x128xf32> to vector<2x32xf32>
    %252 = arith.mulf %249, %216 : vector<2x32xf32>
    %253 = arith.mulf %248, %250 : vector<2x32xf32>
    %254 = arith.addf %252, %253 : vector<2x32xf32>
    %255 = math.tanh %254 : vector<2x32xf32>
    %256 = arith.mulf %251, %255 : vector<2x32xf32>
    %cst_46 = arith.constant dense<0.000000e+00> : vector<2x128xf32>
    %257 = tpu.matmul %256, %3, %cst_46 {dimension_numbers = #tpu.dot_dimension_numbers<[1], [0], [0], [1], [0, 0, 1, 1], [], []>} : vector<2x32xf32>, vector<32x128xf32>, vector<2x128xf32> -> vector<2x128xf32>
    %cst_47 = arith.constant dense<0.000000e+00> : vector<2x128xf32>
    %258 = tpu.matmul %238, %4, %cst_47 {dimension_numbers = #tpu.dot_dimension_numbers<[1], [0], [0], [1], [0, 0, 1, 1], [], []>} : vector<2x32xf32>, vector<32x128xf32>, vector<2x128xf32> -> vector<2x128xf32>
    %259 = arith.addf %257, %258 : vector<2x128xf32>
    %260 = vector.broadcast %5 : vector<1x128xf32> to vector<2x128xf32>
    %261 = arith.addf %259, %260 : vector<2x128xf32>
    %262 = arith.negf %261 : vector<2x128xf32>
    %263 = math.exp %262 : vector<2x128xf32>
    %cst_48 = arith.constant 1.000000e+00 : f32
    %264 = vector.broadcast %cst_48 : f32 to vector<2x128xf32>
    %265 = arith.addf %264, %263 : vector<2x128xf32>
    %266 = arith.divf %264, %265 : vector<2x128xf32>
    %267 = math.tanh %261 : vector<2x128xf32>
    %268 = vector.extract_strided_slice %266 {offsets = [0, 0], sizes = [2, 32], strides = [1, 1]} : vector<2x128xf32> to vector<2x32xf32>
    %269 = vector.extract_strided_slice %266 {offsets = [0, 32], sizes = [2, 32], strides = [1, 1]} : vector<2x128xf32> to vector<2x32xf32>
    %270 = vector.extract_strided_slice %267 {offsets = [0, 64], sizes = [2, 32], strides = [1, 1]} : vector<2x128xf32> to vector<2x32xf32>
    %271 = vector.extract_strided_slice %266 {offsets = [0, 96], sizes = [2, 32], strides = [1, 1]} : vector<2x128xf32> to vector<2x32xf32>
    %272 = arith.mulf %269, %236 : vector<2x32xf32>
    %273 = arith.mulf %268, %270 : vector<2x32xf32>
    %274 = arith.addf %272, %273 : vector<2x32xf32>
    %275 = math.tanh %274 : vector<2x32xf32>
    %276 = arith.mulf %271, %275 : vector<2x32xf32>
    %277 = vector.extract_strided_slice %9 {offsets = [14, 0], sizes = [2, 128], strides = [1, 1]} : vector<16x128xf32> to vector<2x128xf32>
    %cst_49 = arith.constant dense<0.000000e+00> : vector<2x128xf32>
    %278 = tpu.matmul %256, %2, %cst_49 {dimension_numbers = #tpu.dot_dimension_numbers<[1], [0], [0], [1], [0, 0, 1, 1], [], []>} : vector<2x32xf32>, vector<32x128xf32>, vector<2x128xf32> -> vector<2x128xf32>
    %279 = arith.addf %277, %278 : vector<2x128xf32>
    %280 = arith.negf %279 : vector<2x128xf32>
    %281 = math.exp %280 : vector<2x128xf32>
    %cst_50 = arith.constant 1.000000e+00 : f32
    %282 = vector.broadcast %cst_50 : f32 to vector<2x128xf32>
    %283 = arith.addf %282, %281 : vector<2x128xf32>
    %284 = arith.divf %282, %283 : vector<2x128xf32>
    %285 = math.tanh %279 : vector<2x128xf32>
    %286 = vector.extract_strided_slice %284 {offsets = [0, 0], sizes = [2, 32], strides = [1, 1]} : vector<2x128xf32> to vector<2x32xf32>
    %287 = vector.extract_strided_slice %284 {offsets = [0, 32], sizes = [2, 32], strides = [1, 1]} : vector<2x128xf32> to vector<2x32xf32>
    %288 = vector.extract_strided_slice %285 {offsets = [0, 64], sizes = [2, 32], strides = [1, 1]} : vector<2x128xf32> to vector<2x32xf32>
    %289 = vector.extract_strided_slice %284 {offsets = [0, 96], sizes = [2, 32], strides = [1, 1]} : vector<2x128xf32> to vector<2x32xf32>
    %290 = arith.mulf %287, %254 : vector<2x32xf32>
    %291 = arith.mulf %286, %288 : vector<2x32xf32>
    %292 = arith.addf %290, %291 : vector<2x32xf32>
    %293 = math.tanh %292 : vector<2x32xf32>
    %294 = arith.mulf %289, %293 : vector<2x32xf32>
    %cst_51 = arith.constant dense<0.000000e+00> : vector<2x128xf32>
    %295 = tpu.matmul %294, %3, %cst_51 {dimension_numbers = #tpu.dot_dimension_numbers<[1], [0], [0], [1], [0, 0, 1, 1], [], []>} : vector<2x32xf32>, vector<32x128xf32>, vector<2x128xf32> -> vector<2x128xf32>
    %cst_52 = arith.constant dense<0.000000e+00> : vector<2x128xf32>
    %296 = tpu.matmul %276, %4, %cst_52 {dimension_numbers = #tpu.dot_dimension_numbers<[1], [0], [0], [1], [0, 0, 1, 1], [], []>} : vector<2x32xf32>, vector<32x128xf32>, vector<2x128xf32> -> vector<2x128xf32>
    %297 = arith.addf %295, %296 : vector<2x128xf32>
    %298 = vector.broadcast %5 : vector<1x128xf32> to vector<2x128xf32>
    %299 = arith.addf %297, %298 : vector<2x128xf32>
    %300 = arith.negf %299 : vector<2x128xf32>
    %301 = math.exp %300 : vector<2x128xf32>
    %cst_53 = arith.constant 1.000000e+00 : f32
    %302 = vector.broadcast %cst_53 : f32 to vector<2x128xf32>
    %303 = arith.addf %302, %301 : vector<2x128xf32>
    %304 = arith.divf %302, %303 : vector<2x128xf32>
    %305 = math.tanh %299 : vector<2x128xf32>
    %306 = vector.extract_strided_slice %304 {offsets = [0, 0], sizes = [2, 32], strides = [1, 1]} : vector<2x128xf32> to vector<2x32xf32>
    %307 = vector.extract_strided_slice %304 {offsets = [0, 32], sizes = [2, 32], strides = [1, 1]} : vector<2x128xf32> to vector<2x32xf32>
    %308 = vector.extract_strided_slice %305 {offsets = [0, 64], sizes = [2, 32], strides = [1, 1]} : vector<2x128xf32> to vector<2x32xf32>
    %309 = vector.extract_strided_slice %304 {offsets = [0, 96], sizes = [2, 32], strides = [1, 1]} : vector<2x128xf32> to vector<2x32xf32>
    %310 = arith.mulf %307, %274 : vector<2x32xf32>
    %311 = arith.mulf %306, %308 : vector<2x32xf32>
    %312 = arith.addf %310, %311 : vector<2x32xf32>
    %313 = math.tanh %312 : vector<2x32xf32>
    %314 = arith.mulf %309, %313 : vector<2x32xf32>
    %315 = tpu.concatenate %294, %314 in 0 : vector<2x32xf32>, vector<2x32xf32> -> vector<4x32xf32>
    %c0_54 = arith.constant 0 : index
    %c0_55 = arith.constant 0 : index
    %316 = vector.load %arg7[%c0_54, %c0_55] : memref<32x50xf32, #tpu.memory_space<vmem>>, vector<32x50xf32>
    %cst_56 = arith.constant dense<0.000000e+00> : vector<4x50xf32>
    %317 = tpu.matmul %315, %316, %cst_56 {dimension_numbers = #tpu.dot_dimension_numbers<[1], [0], [0], [1], [0, 0, 1, 1], [], []>} : vector<4x32xf32>, vector<32x50xf32>, vector<4x50xf32> -> vector<4x50xf32>
    %c0_57 = arith.constant 0 : index
    %c0_58 = arith.constant 0 : index
    %318 = vector.load %arg8[%c0_57, %c0_58] : memref<1x50xf32, #tpu.memory_space<vmem>>, vector<1x50xf32>
    %319 = vector.broadcast %318 : vector<1x50xf32> to vector<4x50xf32>
    %320 = arith.addf %317, %319 : vector<4x50xf32>
    %cst_59 = arith.constant 0.000000e+00 : f32
    %321 = vector.broadcast %cst_59 : f32 to vector<4x50xf32>
    %322 = arith.maximumf %320, %321 : vector<4x50xf32>
    %c0_60 = arith.constant 0 : index
    %c0_61 = arith.constant 0 : index
    %323 = vector.load %arg9[%c0_60, %c0_61] : memref<50x5xf32, #tpu.memory_space<vmem>>, vector<50x5xf32>
    %cst_62 = arith.constant dense<0.000000e+00> : vector<4x5xf32>
    %324 = tpu.matmul %322, %323, %cst_62 {dimension_numbers = #tpu.dot_dimension_numbers<[1], [0], [0], [1], [0, 0, 1, 1], [], []>} : vector<4x50xf32>, vector<50x5xf32>, vector<4x5xf32> -> vector<4x5xf32>
    %c0_63 = arith.constant 0 : index
    %c0_64 = arith.constant 0 : index
    %325 = vector.load %arg10[%c0_63, %c0_64] : memref<1x5xf32, #tpu.memory_space<vmem>>, vector<1x5xf32>
    %326 = vector.broadcast %325 : vector<1x5xf32> to vector<4x5xf32>
    %327 = arith.addf %324, %326 : vector<4x5xf32>
    %c0_65 = arith.constant 0 : index
    %c0_66 = arith.constant 0 : index
    %328 = vector.load %arg11[%c0_65, %c0_66] : memref<4x5xf32, #tpu.memory_space<vmem>>, vector<4x5xf32>
    tpu.vector_store %arg11[%c0_65, %c0_66], %327 {strides = array<i32>} : memref<4x5xf32, #tpu.memory_space<vmem>>, vector<4x5xf32>,
    return
  }
}

</mosaic_0001>

<bundles_post_ra>
// kernel: classifier_forward.1
= control target key start
LH: loop header
LB: loop body
LE: loop exit
PB: predicated region body
PF: predicated region fallthrough
CT: control target
= control target key end

     0   :  { %16 = vsyncpa [#allocation3], 0  ;;  %s4003_s0 = inlined_call_operand.vmem [shape: f32[16,16], index: 0, kind: input, shape index: {}]   ;;  %s4004_s1 = inlined_call_operand.vmem [shape: f32[16,128], index: 1, kind: input, shape index: {}]   ;;  %s4005_s2 = inlined_call_operand.vmem [shape: f32[1,128], index: 2, kind: input, shape index: {}]   ;;  %s4006_s3 = inlined_call_operand.vmem [shape: f32[32,128], index: 3, kind: input, shape index: {}]   ;;  %s4007_s4 = inlined_call_operand.vmem [shape: f32[32,128], index: 4, kind: input, shape index: {}]   ;;  %s4008_s5 = inlined_call_operand.vmem [shape: f32[32,128], index: 5, kind: input, shape index: {}]   ;;  %s4009_s6 = inlined_call_operand.vmem [shape: f32[1,128], index: 6, kind: input, shape index: {}]   ;;  %s4010_s7 = inlined_call_operand.hbm [shape: f32[32,50], index: 7, kind: input, shape index: {}]   ;;  %s4011_s8 = inlined_call_operand.hbm [shape: f32[1,50], index: 8, kind: input, shape index: {}]   ;;  %s4012_s9 = inlined_call_operand.vmem [shape: f32[50,5], index: 9, kind: input, shape index: {}]   ;;  %s4013_s10 = inlined_call_operand.hbm [shape: f32[1,5], index: 10, kind: input, shape index: {}]   ;;  %s4014_s11 = inlined_call_operand.hbm [shape: f32[4,5], index: 11, kind: output, shape index: {}]  }
   0x1   :  { %17 = vsyncpa [#allocation6], 0 }
   0x2   :  { %18 = vsyncpa [#allocation4], 0  ;;  %s3473_s17 = smov [#allocation5]   ;;  %s3474_s19 = smov [#allocation2]  }
   0x3   :  { %s51_s18 = sshll.u32 %s3473_s17, 4  ;;  %s38_s20 = sshll.u32 %s3474_s19, 4  ;;  %s52_s18 = int_to_ptr.vmem [resolvable:$true] %s51_s18  ;;  %s3544_s20 = int_to_ptr.vmem [resolvable:$true] %s38_s20 }
   0x4   :  { %s3379_s23 = scalar_lea.hbm %s4011_s8, 16 }
   0x5   :  { %p3380_p0 = scmp.ne.s32.totalorder %s4011_s8, %s3379_s23  ;;  %p3383_p1 = scmp.lt.u32.totalorder %s3379_s23, %s4011_s8 }
   0x7   :  { %p3385_p2 = pnand %p3383_p1, %p3380_p0 }
   0x9   :  { %3388 = shalt.err (!%p3385_p2)
}
   0xa   :  { %s3389_s28 = scalar_lea.vmem %s52_s18, 16  ;;  %s3393_s29 = scalar_lea.vmem %s52_s18, 32 }
   0xb   :  { %p3390_p3 = scmp.ne.s32.totalorder %s52_s18, %s3389_s28  ;;  %p3394_p4 = scmp.lt.s32.totalorder %s52_s18, %s52_s18 }
   0xc   :  { %p3395_p5 = scmp.lt.s32.totalorder %s3393_s29, %s3389_s28 }
   0xe   :  { %p3396_p6 = por %p3395_p5, %p3394_p4 }
  0x10   :  { %p3397_p7 = pnand %p3396_p6, %p3390_p3 }
  0x12   :  { %3400 = shalt.err (!%p3397_p7)
}
  0x13   :  { %54 = dma.hbm_to_vmem [thread:$0]  %s4011_s8, 16, %s52_s18, [#allocation6]  }
  0x14   :  { %s3401_s15 = scalar_lea.hbm %s4010_s7, 512 }
  0x15   :  { %p3402_p8 = scmp.ne.s32.totalorder %s4010_s7, %s3401_s15  ;;  %p3405_p9 = scmp.lt.u32.totalorder %s3401_s15, %s4010_s7 }
  0x17   :  { %p3407_p10 = pnand %p3405_p9, %p3402_p8 }
  0x19   :  { %3410 = shalt.err (!%p3407_p10)
}
  0x1a   :  { %s3411_s22 = scalar_lea.vmem %s3544_s20, 512  ;;  %p3416_p12 = scmp.lt.s32.totalorder %s3544_s20, %s3544_s20 }
  0x1b   :  { %p3412_p11 = scmp.ne.s32.totalorder %s3544_s20, %s3411_s22  ;;  %p3417_p13 = scmp.lt.s32.totalorder %s3411_s22, %s3411_s22 }
  0x1d   :  { %p3418_p0 = por %p3417_p13, %p3416_p12 }
  0x1f   :  { %p3419_p1 = pnand %p3418_p0, %p3412_p11 }
  0x21   :  { %3422 = shalt.err (!%p3419_p1)
}
  0x22   :  { %s3475_s8 = smov 128   ;;  %s3476_s18 = smov 8  }
  0x23   :  { %44 = dma.hbm_to_vmem [thread:$0]  %s4010_s7, 512, %s3544_s20, [#allocation3], %s3475_s8, %s3475_s8, %s3476_s18  }
  0x24   :  { %s3477_s25 = smov [#allocation7]   ;;  %s3423_s29 = scalar_lea.hbm %s4013_s10, 16 }
  0x25   :  { %s63_s26 = sshll.u32 %s3477_s25, 4  ;;  %p3424_p2 = scmp.ne.s32.totalorder %s4013_s10, %s3423_s29  ;;  %s64_s26 = int_to_ptr.vmem [resolvable:$true] %s63_s26 }
  0x26   :  { %p3427_p3 = scmp.lt.u32.totalorder %s3423_s29, %s4013_s10 }
  0x28   :  { %p3429_p4 = pnand %p3427_p3, %p3424_p2 }
  0x2a   :  { %3432 = shalt.err (!%p3429_p4)
}
  0x2b   :  { %s3433_s15 = scalar_lea.vmem %s64_s26, 16  ;;  %s3437_s7 = scalar_lea.vmem %s64_s26, 32 }
  0x2c   :  { %p3434_p5 = scmp.ne.s32.totalorder %s64_s26, %s3433_s15  ;;  %p3438_p6 = scmp.lt.s32.totalorder %s64_s26, %s64_s26 }
  0x2d   :  { %p3439_p7 = scmp.lt.s32.totalorder %s3437_s7, %s3433_s15 }
  0x2f   :  { %p3440_p8 = por %p3439_p7, %p3438_p6 }
  0x31   :  { %p3441_p9 = pnand %p3440_p8, %p3434_p5 }
  0x33   :  { %3444 = shalt.err (!%p3441_p9)
}
  0x34   :  { %66 = dma.hbm_to_vmem [thread:$0]  %s4013_s10, 16, %s64_s26, [#allocation6]  }
  0x35   :  { %3467 = dma.done.wait [#allocation3], 512  }
  0x36   :  { %3468 = vsyncadd [#allocation3], 4294966784 }
  0x37   :  { %3469 = dma.done.wait [#allocation6], 32  }
  0x38   :  { %3470 = vsyncadd [#allocation6], 4294967264  ;;  %v3478_v0 = vmov 0.0|0.0   ;;  %vm3479_vm0 = vmmov 0   ;;  %v3480_v1 = vmov 0.0   ;;  %vm100_vm1 = vcmask 130048  }
  0x39   :  { %3087 = vmatprep.subr.bf16.mxu0 %v3478_v0  ;;  %2804 = vmatprep.mubr.msk.f32.mxu0 %vm3479_vm0, %v3480_v1  ;;  %v76_v2 = vld [vmem:[%s4004_s1] sm:$0xff]  ;;  %v77_v3 = vld [vmem:[%s4004_s1 + $0x8] sm:$0xff]  ;;  %v81_v10 = vld [vmem:[%s4006_s3 + $0x10] sm:$0xff]  ;;  %s3481_s12 = smov 64   ;;  %vm182_vm2 = vcmask 261120   ;;  %vm2396_vm3 = vcmask 1041408  }
  0x3a   :  { %v92_v4 = vld [vmem:[%s4003_s0] sm:$0xff]  ;;  %v3077_v5 = vpack.c.bf16 %v77_v3, %v76_v2  ;;  %v80_v7 = vld [vmem:[%s4006_s3 + $0x8] sm:$0xff]  ;;  %v82_v11 = vld [vmem:[%s4006_s3 + $0x18] sm:$0xff]  ;;  %vm2499_vm4 = vcmask 408576   ;;  %vm2576_vm5 = vcmask 35840  }
  0x3b   :  { %2782 = vmatprep.mubr.msk.f32.mxu1 %vm100_vm1, %v92_v4  ;;  %v79_v6 = vld [vmem:[%s4006_s3] sm:$0xff]  ;;  %v93_v8 = vld [vmem:[%s4003_s0 + $0x8] sm:$0xff]  ;;  %v3618_v12 = vpack.c.bf16 %v82_v11, %v81_v10  ;;  %v89_v33 = vld [vmem:[%s4008_s5 + $0x10] sm:$0xff] }
  0x3c   :  { %3078 = vmatprep.subr.bf16.mxu1 %v3077_v5  ;;  %v3608_v9 = vpack.c.bf16 %v80_v7, %v79_v6  ;;  %v2594_v13 = vld [vmem:[%s4005_s2] ss:$0 sm:$0xff]  ;;  %s3482_s2 = smov 32   ;;  %v88_v32 = vld [vmem:[%s4008_s5 + $0x8] sm:$0xff]  ;;  %v90_v35 = vld [vmem:[%s4008_s5 + $0x18] sm:$0xff] }
  0x3d   :  { %3080 = vmatpush3.bf16.msra.mxu1 %v3077_v5  ;;  %v87_v31 = vld [vmem:[%s4008_s5] sm:$0xff]  ;;  %v84_v37 = vld [vmem:[%s4007_s4 + $0x8] sm:$0xff]  ;;  %v85_v39 = vld [vmem:[%s4007_s4 + $0x10] sm:$0xff]  ;;  %v3670_v41 = vpack.c.bf16 %v90_v35, %v89_v33 }
  0x3e   :  { %3081 = vmatprep.subr.bf16.mxu1 %v3478_v0  ;;  %v3650_v34 = vpack.c.bf16 %v88_v32, %v87_v31  ;;  %v83_v36 = vld [vmem:[%s4007_s4] sm:$0xff]  ;;  %v86_v40 = vld [vmem:[%s4007_s4 + $0x18] sm:$0xff] }
  0x3f   :  { %v3661_v38 = vpack.c.bf16 %v84_v37, %v83_v36  ;;  %v3674_v42 = vpack.c.bf16 %v86_v40, %v85_v39  ;;  %v3707_v49 = vld [vmem:[%s4009_s6] ss:$0 sm:$0xff] }
  0x40   :  { %2783 = vmatmul.mubr.msk.f32.vlgmr.msra.gmra.mrb[0].mxu1 %vm100_vm1, %v93_v8  ;;  %3089 = vmatpush3.bf16.msra.mxu0 %v3650_v34 }
  0x41   :  { %3083 = vmatpush3.bf16.msra.mxu1 %v3608_v9  ;;  %2793 = vmatprep.mubr.msk.f32.mxu1 %vm3479_vm0, %v3480_v1 }
  0x42   :  { %3084 = vmatprep.subr.bf16.mxu1 %v3478_v0  ;;  %3090 = vmatprep.subr.bf16.mxu0 %v3478_v0 }
  0x44   :  { %3092 = vmatpush3.bf16.msra.mxu0 %v3670_v41 }
  0x45   :  { %3086 = vmatpush3.bf16.msra.mxu1 %v3618_v12  ;;  %3099 = vmatprep.subr.bf16.mxu0 %v3478_v0 }
  0x46   :  { %3093 = vmatprep.subr.bf16.mxu1 %v3478_v0 }
  0x47   :  { %2805 = vmatmul.mubr.f32.vlgmr.msra.gmra.mrb[0].mxu0 %v3480_v1 }
  0x48   :  { %2794 = vmatmul.mubr.f32.vlgmr.msra.gmra.mrb[2].mxu1 %v3480_v1  ;;  %3101 = vmatpush3.bf16.msra.mxu0 %v3608_v9 }
  0x49   :  { %2815 = vmatprep.mubr.msk.f32.mxu1 %vm3479_vm0, %v3480_v1  ;;  %3095 = vmatpush3.bf16.msra.mxu1 %v3661_v38 }
  0x4a   :  { %3096 = vmatprep.subr.bf16.mxu1 %v3478_v0  ;;  %3102 = vmatprep.subr.bf16.mxu0 %v3478_v0 }
  0x4b   :  { %2826 = vmatprep.mubr.msk.f32.mxu0 %vm3479_vm0, %v3480_v1 }
  0x4c   :  { %3104 = vmatpush3.bf16.msra.mxu0 %v3618_v12 }
  0x4d   :  { %3098 = vmatpush3.bf16.msra.mxu1 %v3674_v42  ;;  %3111 = vmatprep.subr.bf16.mxu0 %v3478_v0 }
  0x4e   :  { %3105 = vmatprep.subr.bf16.mxu1 %v3478_v0 }
 0x113   :  { %v2784_v14 = vpop.f32.mrb[0].mxu1 }
 0x114   :  { %v3631_v15 = vadd.f32 %v2784_v14, %v2594_v13  ;;  %v173_v16 = vpop.f32.mrb[1].mxu1 }
 0x115   :  { %v3633_v17 = vadd.f32 %v2594_v13, %v173_v16 }
 0x11a   :  { %v347_v46 = vpop.f32.mrb[0].mxu0 }
 0x11b   :  { %v252_v18 = vpop.f32.mrb[2].mxu1  ;;  %v2806_v47 = vpop.f32.mrb[1].mxu0 }
 0x11c   :  { %v256_v19 = vadd.f32 %v252_v18, %v3633_v17  ;;  %v2795_v20 = vpop.f32.mrb[3].mxu1 }
 0x11e   :  { %3251 = vtanh.f32 %v256_v19  ;;  %v2597_v22 = vmul.f32 -1.442695, %v256_v19 }
 0x120   :  { %3253 = vpow2.f32 %v2597_v22 }
 0x128   :  { %v3252_v21 = vpop.eup %3251 }
 0x129   :  { %266 = vrot.lane.b32.xlu0 %v3252_v21, %s3481_s12 }
 0x12a   :  { %v3254_v23 = vpop.eup %3253 }
 0x12b   :  { %v260_v24 = vadd.f32 1.0, %v3254_v23 }
 0x12d   :  { %3255 = vrcp.f32 %v260_v24 }
 0x137   :  { %v3256_v25 = vpop.eup %3255 }
 0x138   :  { %v264_v28 = vmul.f32 0.0, %v3256_v25 }
 0x19b   :  { %v267_v26 = vpop.permute.xlu0 %266 }
 0x19c   :  { %v269_v27 = vmul.f32 %v3256_v25, %v267_v26 }
 0x19e   :  { %271 = vrot.lane.b32.xlu0 %v269_v27, %s3482_s2 }
 0x210   :  { %v272_v29 = vpop.permute.xlu0 %271 }
 0x211   :  { %v3638_v30 = vadd.f32 %v272_v29, %v264_v28 }
 0x213   :  { %3257 = vtanh.f32 %v3638_v30  ;;  %v539_v11 = vrot.slane %v3638_v30, 6 }
 0x21d   :  { %v3258_v43 = vpop.eup %3257 }
 0x21e   :  { %277 = vrot.lane.b32.xlu1 %v3258_v43, %s3481_s12 }
 0x290   :  { %v278_v44 = vpop.permute.xlu1 %277 }
 0x291   :  { %v280_v45 = vmul.f32 %v3256_v25, %v278_v44 }
 0x293   :  { %352 = vrot.lane.b32.xlu1 %v280_v45, %s3482_s2 }
 0x305   :  { %v353_v48 = vpop.permute.xlu1 %352 }
 0x306   :  { %2816 = vmatmul.mubr.msk.f32.vlgmr.msra.gmra.mrb[4].mxu1 %vm182_vm2, %v353_v48  ;;  %2827 = vmatmul.mubr.msk.f32.vlgmr.msra.gmra.mrb[2].mxu0 %vm182_vm2, %v353_v48 }
 0x307   :  { %3107 = vmatpush3.bf16.msra.mxu1 %v3650_v34  ;;  %3113 = vmatpush3.bf16.msra.mxu0 %v3661_v38 }
 0x308   :  { %3108 = vmatprep.subr.bf16.mxu1 %v3478_v0  ;;  %3114 = vmatprep.subr.bf16.mxu0 %v3478_v0 }
 0x309   :  { %2837 = vmatprep.mubr.msk.f32.mxu1 %vm3479_vm0, %v3480_v1  ;;  %2848 = vmatprep.mubr.msk.f32.mxu0 %vm3479_vm0, %v3480_v1 }
 0x30b   :  { %3110 = vmatpush3.bf16.msra.mxu1 %v3670_v41  ;;  %3116 = vmatpush3.bf16.msra.mxu0 %v3674_v42 }
 0x30c   :  { %3117 = vmatprep.subr.bf16.mxu1 %v3478_v0  ;;  %3123 = vmatprep.subr.bf16.mxu0 %v3478_v0 }
 0x3d9   :  { %v422_v50 = vpop.f32.mrb[4].mxu1  ;;  %v523_v51 = vpop.f32.mrb[2].mxu0 }
 0x3da   :  { %v423_v52 = vadd.f32 %v422_v50, %v347_v46  ;;  %v528_v53 = vrot.slane %v523_v51, 6  ;;  %v2817_v54 = vpop.f32.mrb[5].mxu1  ;;  %v2828_v55 = vpop.f32.mrb[3].mxu0 }
 0x3dc   :  { %v432_v56 = vadd.f32 %v3707_v49, %v423_v52  ;;  %v530_v57 = vadd.f32 %v528_v53, %v3633_v17 }
 0x3de   :  { %3259 = vtanh.f32 %v432_v56  ;;  %v2600_v60 = vmul.f32 -1.442695, %v432_v56  ;;  %v2602_v61 = vmul.f32 -1.442695, %v530_v57 }
 0x3df   :  { %3261 = vtanh.f32 %v530_v57 }
 0x3e0   :  { %3263 = vpow2.f32 %v2600_v60 }
 0x3e1   :  { %3265 = vpow2.f32 %v2602_v61 }
 0x3e8   :  { %v3260_v58 = vpop.eup %3259 }
 0x3e9   :  { %v3262_v59 = vpop.eup %3261  ;;  %442 = vrot.lane.b32.xlu0 %v3260_v58, %s3481_s12 }
 0x3ea   :  { %543 = vrot.lane.b32.xlu1 %v3262_v59, %s3481_s12  ;;  %v3264_v62 = vpop.eup %3263 }
 0x3eb   :  { %v3266_v63 = vpop.eup %3265  ;;  %v436_v2 = vadd.f32 1.0, %v3264_v62 }
 0x3ec   :  { %v534_v3 = vadd.f32 1.0, %v3266_v63 }
 0x3ed   :  { %3267 = vrcp.f32 %v436_v2 }
 0x3ee   :  { %3269 = vrcp.f32 %v534_v3 }
 0x3f7   :  { %v3268_v4 = vpop.eup %3267 }
 0x3f8   :  { %v3270_v6 = vpop.eup %3269  ;;  %v440_v13 = vmul.f32 0.0, %v3268_v4 }
 0x3f9   :  { %v541_v14 = vmul.f32 %v3270_v6, %v539_v11 }
 0x45b   :  { %v443_v5 = vpop.permute.xlu0 %442 }
 0x45c   :  { %v544_v7 = vpop.permute.xlu1 %543  ;;  %v445_v8 = vmul.f32 %v3268_v4, %v443_v5 }
 0x45d   :  { %v546_v10 = vmul.f32 %v3270_v6, %v544_v7 }
 0x45e   :  { %447 = vrot.lane.b32.xlu0 %v445_v8, %s3482_s2 }
 0x45f   :  { %548 = vrot.lane.b32.xlu1 %v546_v10, %s3482_s2 }
 0x4d0   :  { %v448_v16 = vpop.permute.xlu0 %447 }
 0x4d1   :  { %v549_v18 = vpop.permute.xlu1 %548  ;;  %v3716_v19 = vadd.f32 %v448_v16, %v440_v13 }
 0x4d2   :  { %v3718_v20 = vadd.f32 %v549_v18, %v541_v14 }
 0x4d3   :  { %3271 = vtanh.f32 %v3716_v19 }
 0x4d4   :  { %3273 = vtanh.f32 %v3718_v20  ;;  %v816_v62 = vrot.slane %v3718_v20, 6 }
 0x4dd   :  { %v3272_v21 = vpop.eup %3271 }
 0x4de   :  { %v3274_v22 = vpop.eup %3273  ;;  %453 = vrot.lane.b32.xlu0 %v3272_v21, %s3481_s12 }
 0x4df   :  { %554 = vrot.lane.b32.xlu1 %v3274_v22, %s3481_s12 }
 0x550   :  { %v454_v23 = vpop.permute.xlu0 %453 }
 0x551   :  { %v555_v24 = vpop.permute.xlu1 %554  ;;  %v456_v25 = vmul.f32 %v3268_v4, %v454_v23 }
 0x552   :  { %v557_v26 = vmul.f32 %v3270_v6, %v555_v24 }
 0x553   :  { %559 = vrot.lane.b32.xlu0 %v456_v25, %s3482_s2 }
 0x554   :  { %v634_v27 = vrot.slane %v557_v26, 2 }
 0x556   :  { %635 = vrot.lane.b32.xlu1 %v634_v27, %s3482_s2 }
 0x5c5   :  { %v560_v28 = vpop.permute.xlu0 %559 }
 0x5c6   :  { %2838 = vmatmul.mubr.msk.f32.vlgmr.msra.gmra.mrb[6].mxu1 %vm182_vm2, %v560_v28 }
 0x5c7   :  { %3119 = vmatpush3.bf16.msra.mxu1 %v3608_v9  ;;  %2859 = vmatprep.mubr.msk.f32.mxu1 %vm3479_vm0, %v3480_v1 }
 0x5c8   :  { %v636_v29 = vpop.permute.xlu1 %635  ;;  %3120 = vmatprep.subr.bf16.mxu1 %v3478_v0 }
 0x5c9   :  { %2849 = vmatmul.mubr.msk.f32.vlgmr.msra.gmra.mrb[4].mxu0 %vm182_vm2, %v636_v29 }
 0x5ca   :  { %3125 = vmatpush3.bf16.msra.mxu0 %v3650_v34  ;;  %2870 = vmatprep.mubr.msk.f32.mxu0 %vm3479_vm0, %v3480_v1 }
 0x5cb   :  { %3122 = vmatpush3.bf16.msra.mxu1 %v3618_v12  ;;  %3126 = vmatprep.subr.bf16.mxu0 %v3478_v0 }
 0x5cc   :  { %3129 = vmatprep.subr.bf16.mxu1 %v3478_v0 }
 0x5ce   :  { %2860 = vmatmul.mubr.msk.f32.vlgmr.msra.gmra.mrb[8].mxu1 %vm182_vm2, %v636_v29  ;;  %3128 = vmatpush3.bf16.msra.mxu0 %v3670_v41 }
 0x5cf   :  { %3135 = vmatprep.subr.bf16.mxu0 %v3478_v0  ;;  %3131 = vmatpush3.bf16.msra.mxu1 %v3661_v38 }
 0x5d0   :  { %3132 = vmatprep.subr.bf16.mxu1 %v3478_v0  ;;  %2881 = vmatprep.mubr.msk.f32.mxu1 %vm3479_vm0, %v3480_v1 }
 0x5d3   :  { %3134 = vmatpush3.bf16.msra.mxu1 %v3674_v42 }
 0x5d4   :  { %3141 = vmatprep.subr.bf16.mxu1 %v3478_v0 }
 0x699   :  { %v629_v30 = vpop.f32.mrb[6].mxu1 }
 0x69a   :  { %v2839_v31 = vpop.f32.mrb[7].mxu1 }
 0x69c   :  { %v705_v32 = vpop.f32.mrb[4].mxu0 }
 0x69d   :  { %v706_v33 = vadd.f32 %v705_v32, %v629_v30  ;;  %v2850_v35 = vpop.f32.mrb[5].mxu0 }
 0x69f   :  { %v709_v36 = vadd.f32 %v3707_v49, %v706_v33 }
 0x6a1   :  { %3275 = vtanh.f32 %v709_v36  ;;  %v800_v37 = vpop.f32.mrb[8].mxu1  ;;  %v2605_v46 = vmul.f32 -1.442695, %v709_v36 }
 0x6a2   :  { %v805_v39 = vrot.slane %v800_v37, 4  ;;  %v2861_v40 = vpop.f32.mrb[9].mxu1 }
 0x6a4   :  { %v807_v43 = vadd.f32 %v805_v39, %v3633_v17 }
 0x6a6   :  { %3277 = vtanh.f32 %v807_v43  ;;  %v2607_v47 = vmul.f32 -1.442695, %v807_v43 }
 0x6a7   :  { %3279 = vpow2.f32 %v2605_v46 }
 0x6a8   :  { %3281 = vpow2.f32 %v2607_v47 }
 0x6ab   :  { %v3276_v44 = vpop.eup %3275 }
 0x6ac   :  { %719 = vrot.lane.b32.xlu0 %v3276_v44, %s3481_s12 }
 0x6b0   :  { %v3278_v45 = vpop.eup %3277 }
 0x6b1   :  { %820 = vrot.lane.b32.xlu1 %v3278_v45, %s3481_s12  ;;  %v3280_v48 = vpop.eup %3279 }
 0x6b2   :  { %v713_v50 = vadd.f32 1.0, %v3280_v48  ;;  %v3282_v51 = vpop.eup %3281 }
 0x6b3   :  { %v811_v52 = vadd.f32 1.0, %v3282_v51 }
 0x6b4   :  { %3283 = vrcp.f32 %v713_v50 }
 0x6b5   :  { %3285 = vrcp.f32 %v811_v52 }
 0x6be   :  { %v3284_v53 = vpop.eup %3283 }
 0x6bf   :  { %v3286_v56 = vpop.eup %3285  ;;  %v717_v59 = vmul.f32 %v3284_v53, %v3716_v19 }
 0x6c0   :  { %v818_v63 = vmul.f32 %v3286_v56, %v816_v62 }
 0x71e   :  { %v720_v54 = vpop.permute.xlu0 %719 }
 0x71f   :  { %v722_v55 = vmul.f32 %v3284_v53, %v720_v54 }
 0x721   :  { %724 = vrot.lane.b32.xlu0 %v722_v55, %s3482_s2 }
 0x723   :  { %v821_v57 = vpop.permute.xlu1 %820 }
 0x724   :  { %v823_v58 = vmul.f32 %v3286_v56, %v821_v57 }
 0x726   :  { %825 = vrot.lane.b32.xlu1 %v823_v58, %s3482_s2 }
 0x793   :  { %v725_v60 = vpop.permute.xlu0 %724 }
 0x794   :  { %v3754_v61 = vadd.f32 %v725_v60, %v717_v59 }
 0x796   :  { %3287 = vtanh.f32 %v3754_v61 }
 0x798   :  { %v826_v2 = vpop.permute.xlu1 %825 }
 0x799   :  { %v3758_v3 = vadd.f32 %v826_v2, %v818_v63 }
 0x79b   :  { %3289 = vtanh.f32 %v3758_v3  ;;  %v1093_v44 = vrot.slane %v3758_v3, 6 }
 0x7a0   :  { %v3288_v4 = vpop.eup %3287 }
 0x7a1   :  { %730 = vrot.lane.b32.xlu0 %v3288_v4, %s3481_s12 }
 0x7a5   :  { %v3290_v5 = vpop.eup %3289 }
 0x7a6   :  { %831 = vrot.lane.b32.xlu1 %v3290_v5, %s3481_s12 }
 0x813   :  { %v731_v6 = vpop.permute.xlu0 %730 }
 0x814   :  { %v733_v7 = vmul.f32 %v3284_v53, %v731_v6 }
 0x816   :  { %836 = vrot.lane.b32.xlu0 %v733_v7, %s3482_s2 }
 0x818   :  { %v832_v8 = vpop.permute.xlu1 %831 }
 0x819   :  { %v834_v10 = vmul.f32 %v3286_v56, %v832_v8 }
 0x81b   :  { %v911_v11 = vrot.slane %v834_v10, 4 }
 0x81d   :  { %912 = vrot.lane.b32.xlu1 %v911_v11, %s3482_s2 }
 0x888   :  { %v837_v13 = vpop.permute.xlu0 %836 }
 0x889   :  { %2871 = vmatmul.mubr.msk.f32.vlgmr.msra.gmra.mrb[6].mxu0 %vm182_vm2, %v837_v13 }
 0x88a   :  { %3137 = vmatpush3.bf16.msra.mxu0 %v3608_v9  ;;  %2892 = vmatprep.mubr.msk.f32.mxu0 %vm3479_vm0, %v3480_v1 }
 0x88b   :  { %3138 = vmatprep.subr.bf16.mxu0 %v3478_v0 }
 0x88e   :  { %3140 = vmatpush3.bf16.msra.mxu0 %v3618_v12 }
 0x88f   :  { %v913_v14 = vpop.permute.xlu1 %912  ;;  %3147 = vmatprep.subr.bf16.mxu0 %v3478_v0 }
 0x890   :  { %2882 = vmatmul.mubr.msk.f32.vlgmr.msra.gmra.mrb[10].mxu1 %vm182_vm2, %v913_v14 }
 0x891   :  { %2893 = vmatmul.mubr.msk.f32.vlgmr.msra.gmra.mrb[8].mxu0 %vm182_vm2, %v913_v14  ;;  %3143 = vmatpush3.bf16.msra.mxu1 %v3650_v34 }
 0x892   :  { %3144 = vmatprep.subr.bf16.mxu1 %v3478_v0  ;;  %3149 = vmatpush3.bf16.msra.mxu0 %v3661_v38 }
 0x893   :  { %3150 = vmatprep.subr.bf16.mxu0 %v3478_v0  ;;  %2903 = vmatprep.mubr.msk.f32.mxu1 %vm3479_vm0, %v3480_v1 }
 0x894   :  { %2914 = vmatprep.mubr.msk.f32.mxu0 %vm3479_vm0, %v3480_v1 }
 0x895   :  { %3146 = vmatpush3.bf16.msra.mxu1 %v3670_v41 }
 0x896   :  { %3152 = vmatpush3.bf16.msra.mxu0 %v3674_v42  ;;  %3153 = vmatprep.subr.bf16.mxu1 %v3478_v0 }
 0x897   :  { %3159 = vmatprep.subr.bf16.mxu0 %v3478_v0 }
 0x95c   :  { %v906_v16 = vpop.f32.mrb[6].mxu0 }
 0x95d   :  { %v2872_v18 = vpop.f32.mrb[7].mxu0 }
 0x963   :  { %v982_v19 = vpop.f32.mrb[10].mxu1 }
 0x964   :  { %v983_v20 = vadd.f32 %v982_v19, %v906_v16  ;;  %v1077_v21 = vpop.f32.mrb[8].mxu0  ;;  %v2883_v22 = vpop.f32.mrb[11].mxu1 }
 0x965   :  { %v1082_v23 = vrot.slane %v1077_v21, 2  ;;  %v2894_v24 = vpop.f32.mrb[9].mxu0 }
 0x966   :  { %v986_v25 = vadd.f32 %v3707_v49, %v983_v20 }
 0x967   :  { %v1084_v26 = vadd.f32 %v1082_v23, %v3633_v17 }
 0x968   :  { %3291 = vtanh.f32 %v986_v25  ;;  %v2610_v29 = vmul.f32 -1.442695, %v986_v25 }
 0x969   :  { %3293 = vtanh.f32 %v1084_v26  ;;  %v2612_v30 = vmul.f32 -1.442695, %v1084_v26 }
 0x96a   :  { %3295 = vpow2.f32 %v2610_v29 }
 0x96b   :  { %3297 = vpow2.f32 %v2612_v30 }
 0x972   :  { %v3292_v27 = vpop.eup %3291 }
 0x973   :  { %v3294_v28 = vpop.eup %3293  ;;  %996 = vrot.lane.b32.xlu1 %v3292_v27, %s3481_s12 }
 0x974   :  { %1097 = vrot.lane.b32.xlu0 %v3294_v28, %s3481_s12  ;;  %v3296_v31 = vpop.eup %3295 }
 0x975   :  { %v3298_v32 = vpop.eup %3297  ;;  %v990_v33 = vadd.f32 1.0, %v3296_v31 }
 0x976   :  { %v1088_v35 = vadd.f32 1.0, %v3298_v32 }
 0x977   :  { %3299 = vrcp.f32 %v990_v33 }
 0x978   :  { %3301 = vrcp.f32 %v1088_v35 }
 0x981   :  { %v3300_v36 = vpop.eup %3299 }
 0x982   :  { %v3302_v37 = vpop.eup %3301  ;;  %v994_v45 = vmul.f32 %v3300_v36, %v3754_v61 }
 0x983   :  { %v1095_v46 = vmul.f32 %v3302_v37, %v1093_v44 }
 0x9e5   :  { %v997_v17 = vpop.permute.xlu1 %996 }
 0x9e6   :  { %v1098_v39 = vpop.permute.xlu0 %1097  ;;  %v999_v40 = vmul.f32 %v3300_v36, %v997_v17 }
 0x9e7   :  { %v1100_v43 = vmul.f32 %v3302_v37, %v1098_v39 }
 0x9e8   :  { %1001 = vrot.lane.b32.xlu1 %v999_v40, %s3482_s2 }
 0x9e9   :  { %1102 = vrot.lane.b32.xlu0 %v1100_v43, %s3482_s2 }
 0xa5a   :  { %v1002_v47 = vpop.permute.xlu1 %1001 }
 0xa5b   :  { %v1103_v48 = vpop.permute.xlu0 %1102  ;;  %v3794_v50 = vadd.f32 %v1002_v47, %v994_v45 }
 0xa5c   :  { %v3796_v51 = vadd.f32 %v1103_v48, %v1095_v46 }
 0xa5d   :  { %3303 = vtanh.f32 %v3794_v50 }
 0xa5e   :  { %3305 = vtanh.f32 %v3796_v51  ;;  %v1367_v27 = vrot.slane %v3796_v51, 6 }
 0xa67   :  { %v3304_v52 = vpop.eup %3303 }
 0xa68   :  { %v3306_v53 = vpop.eup %3305  ;;  %1007 = vrot.lane.b32.xlu1 %v3304_v52, %s3481_s12 }
 0xa69   :  { %1108 = vrot.lane.b32.xlu0 %v3306_v53, %s3481_s12 }
 0xada   :  { %v1008_v54 = vpop.permute.xlu1 %1007 }
 0xadb   :  { %v1109_v55 = vpop.permute.xlu0 %1108  ;;  %v1010_v56 = vmul.f32 %v3300_v36, %v1008_v54 }
 0xadc   :  { %v1111_v57 = vmul.f32 %v3302_v37, %v1109_v55 }
 0xadd   :  { %1113 = vrot.lane.b32.xlu0 %v1010_v56, %s3482_s2 }
 0xade   :  { %v1188_v58 = vrot.slane %v1111_v57, 6 }
 0xae0   :  { %1189 = vrot.lane.b32.xlu1 %v1188_v58, %s3482_s2 }
 0xb4f   :  { %v1114_v59 = vpop.permute.xlu0 %1113 }
 0xb50   :  { %2904 = vmatmul.mubr.msk.f32.vlgmr.msra.gmra.mrb[12].mxu1 %vm182_vm2, %v1114_v59 }
 0xb51   :  { %3155 = vmatpush3.bf16.msra.mxu1 %v3608_v9  ;;  %2925 = vmatprep.mubr.msk.f32.mxu1 %vm3479_vm0, %v3480_v1 }
 0xb52   :  { %v1190_v60 = vpop.permute.xlu1 %1189  ;;  %3156 = vmatprep.subr.bf16.mxu1 %v3478_v0 }
 0xb53   :  { %2915 = vmatmul.mubr.msk.f32.vlgmr.msra.gmra.mrb[10].mxu0 %vm182_vm2, %v1190_v60 }
 0xb54   :  { %3161 = vmatpush3.bf16.msra.mxu0 %v3650_v34  ;;  %2936 = vmatprep.mubr.msk.f32.mxu0 %vm3479_vm0, %v3480_v1 }
 0xb55   :  { %3158 = vmatpush3.bf16.msra.mxu1 %v3618_v12  ;;  %3162 = vmatprep.subr.bf16.mxu0 %v3478_v0 }
 0xb56   :  { %3165 = vmatprep.subr.bf16.mxu1 %v3478_v0 }
 0xb58   :  { %2926 = vmatmul.mubr.msk.f32.vlgmr.msra.gmra.mrb[14].mxu1 %vm182_vm2, %v1190_v60  ;;  %3164 = vmatpush3.bf16.msra.mxu0 %v3670_v41 }
 0xb59   :  { %3167 = vmatpush3.bf16.msra.mxu1 %v3661_v38  ;;  %3171 = vmatprep.subr.bf16.mxu0 %v3478_v0 }
 0xb5a   :  { %3168 = vmatprep.subr.bf16.mxu1 %v3478_v0  ;;  %2947 = vmatprep.mubr.msk.f32.mxu1 %vm3479_vm0, %v3480_v1 }
 0xb5d   :  { %3170 = vmatpush3.bf16.msra.mxu1 %v3674_v42 }
 0xb5e   :  { %3177 = vmatprep.subr.bf16.mxu1 %v3478_v0 }
 0xc23   :  { %v1183_v61 = vpop.f32.mrb[12].mxu1 }
 0xc24   :  { %v2905_v62 = vpop.f32.mrb[13].mxu1 }
 0xc26   :  { %v1259_v63 = vpop.f32.mrb[10].mxu0 }
 0xc27   :  { %v1260_v2 = vadd.f32 %v1259_v63, %v1183_v61  ;;  %v2916_v3 = vpop.f32.mrb[11].mxu0 }
 0xc29   :  { %v1263_v4 = vadd.f32 %v3707_v49, %v1260_v2 }
 0xc2b   :  { %3307 = vtanh.f32 %v1263_v4  ;;  %v1354_v5 = vpop.f32.mrb[14].mxu1  ;;  %v2615_v11 = vmul.f32 -1.442695, %v1263_v4 }
 0xc2c   :  { %v1358_v6 = vadd.f32 %v1354_v5, %v3631_v15  ;;  %v2927_v7 = vpop.f32.mrb[15].mxu1 }
 0xc2e   :  { %3309 = vtanh.f32 %v1358_v6  ;;  %v2617_v13 = vmul.f32 -1.442695, %v1358_v6 }
 0xc2f   :  { %3311 = vpow2.f32 %v2615_v11 }
 0xc30   :  { %3313 = vpow2.f32 %v2617_v13 }
 0xc35   :  { %v3308_v8 = vpop.eup %3307 }
 0xc36   :  { %1273 = vrot.lane.b32.xlu0 %v3308_v8, %s3481_s12 }
 0xc38   :  { %v3310_v10 = vpop.eup %3309 }
 0xc39   :  { %1371 = vrot.lane.b32.xlu1 %v3310_v10, %s3481_s12  ;;  %v3312_v14 = vpop.eup %3311 }
 0xc3a   :  { %v3314_v16 = vpop.eup %3313  ;;  %v1267_v18 = vadd.f32 1.0, %v3312_v14 }
 0xc3b   :  { %v1362_v19 = vadd.f32 1.0, %v3314_v16 }
 0xc3c   :  { %3315 = vrcp.f32 %v1267_v18 }
 0xc3d   :  { %3317 = vrcp.f32 %v1362_v19 }
 0xc46   :  { %v3316_v20 = vpop.eup %3315 }
 0xc47   :  { %v3318_v23 = vpop.eup %3317  ;;  %v1271_v26 = vmul.f32 %v3316_v20, %v3794_v50 }
 0xc48   :  { %v1369_v30 = vmul.f32 %v3318_v23, %v1367_v27 }
 0xca8   :  { %v1274_v21 = vpop.permute.xlu0 %1273 }
 0xca9   :  { %v1276_v22 = vmul.f32 %v3316_v20, %v1274_v21 }
 0xcab   :  { %1278 = vrot.lane.b32.xlu0 %v1276_v22, %s3482_s2  ;;  %v1372_v24 = vpop.permute.xlu1 %1371 }
 0xcac   :  { %v1374_v25 = vmul.f32 %v3318_v23, %v1372_v24 }
 0xcae   :  { %1376 = vrot.lane.b32.xlu1 %v1374_v25, %s3482_s2 }
 0xd1d   :  { %v1279_v28 = vpop.permute.xlu0 %1278 }
 0xd1e   :  { %v3833_v29 = vadd.f32 %v1279_v28, %v1271_v26 }
 0xd20   :  { %3319 = vtanh.f32 %v3833_v29  ;;  %v1377_v31 = vpop.permute.xlu1 %1376 }
 0xd21   :  { %v3836_v32 = vadd.f32 %v1377_v31, %v1369_v30 }
 0xd23   :  { %3321 = vtanh.f32 %v3836_v32  ;;  %v1643_v11 = vrot.slane %v3836_v32, 6 }
 0xd2a   :  { %v3320_v33 = vpop.eup %3319 }
 0xd2b   :  { %1284 = vrot.lane.b32.xlu0 %v3320_v33, %s3481_s12 }
 0xd2d   :  { %v3322_v35 = vpop.eup %3321 }
 0xd2e   :  { %1382 = vrot.lane.b32.xlu1 %v3322_v35, %s3481_s12 }
 0xd9d   :  { %v1285_v36 = vpop.permute.xlu0 %1284 }
 0xd9e   :  { %v1287_v17 = vmul.f32 %v3316_v20, %v1285_v36 }
 0xda0   :  { %1387 = vrot.lane.b32.xlu0 %v1287_v17, %s3482_s2  ;;  %v1383_v37 = vpop.permute.xlu1 %1382 }
 0xda1   :  { %v1385_v39 = vmul.f32 %v3318_v23, %v1383_v37 }
 0xda3   :  { %1462 = vrot.lane.b32.xlu1 %v1385_v39, %s3482_s2 }
 0xe12   :  { %v1388_v40 = vpop.permute.xlu0 %1387 }
 0xe13   :  { %2937 = vmatmul.mubr.msk.f32.vlgmr.msra.gmra.mrb[12].mxu0 %vm182_vm2, %v1388_v40 }
 0xe14   :  { %3173 = vmatpush3.bf16.msra.mxu0 %v3608_v9  ;;  %2958 = vmatprep.mubr.msk.f32.mxu0 %vm3479_vm0, %v3480_v1 }
 0xe15   :  { %v1463_v43 = vpop.permute.xlu1 %1462  ;;  %3174 = vmatprep.subr.bf16.mxu0 %v3478_v0 }
 0xe16   :  { %2948 = vmatmul.mubr.msk.f32.vlgmr.msra.gmra.mrb[16].mxu1 %vm182_vm2, %v1463_v43 }
 0xe17   :  { %3179 = vmatpush3.bf16.msra.mxu1 %v3650_v34  ;;  %2969 = vmatprep.mubr.msk.f32.mxu1 %vm3479_vm0, %v3480_v1 }
 0xe18   :  { %3176 = vmatpush3.bf16.msra.mxu0 %v3618_v12  ;;  %3180 = vmatprep.subr.bf16.mxu1 %v3478_v0 }
 0xe19   :  { %3183 = vmatprep.subr.bf16.mxu0 %v3478_v0 }
 0xe1b   :  { %2959 = vmatmul.mubr.msk.f32.vlgmr.msra.gmra.mrb[14].mxu0 %vm182_vm2, %v1463_v43  ;;  %3182 = vmatpush3.bf16.msra.mxu1 %v3670_v41 }
 0xe1c   :  { %3185 = vmatpush3.bf16.msra.mxu0 %v3661_v38  ;;  %3189 = vmatprep.subr.bf16.mxu1 %v3478_v0 }
 0xe1d   :  { %3186 = vmatprep.subr.bf16.mxu0 %v3478_v0  ;;  %2980 = vmatprep.mubr.msk.f32.mxu0 %vm3479_vm0, %v3480_v1 }
 0xe20   :  { %3188 = vmatpush3.bf16.msra.mxu0 %v3674_v42 }
 0xe21   :  { %3195 = vmatprep.subr.bf16.mxu0 %v3478_v0 }
 0xee6   :  { %v1457_v44 = vpop.f32.mrb[12].mxu0 }
 0xee7   :  { %v2938_v45 = vpop.f32.mrb[13].mxu0 }
 0xee9   :  { %v1532_v46 = vpop.f32.mrb[16].mxu1 }
 0xeea   :  { %v1533_v47 = vadd.f32 %v1532_v46, %v1457_v44  ;;  %v2949_v48 = vpop.f32.mrb[17].mxu1 }
 0xeec   :  { %v1536_v50 = vadd.f32 %v3707_v49, %v1533_v47 }
 0xeee   :  { %3323 = vtanh.f32 %v1536_v50  ;;  %v1627_v51 = vpop.f32.mrb[14].mxu0  ;;  %v2620_v57 = vmul.f32 -1.442695, %v1536_v50 }
 0xeef   :  { %v1632_v52 = vrot.slane %v1627_v51, 6  ;;  %v2960_v53 = vpop.f32.mrb[15].mxu0 }
 0xef1   :  { %v1634_v54 = vadd.f32 %v1632_v52, %v3631_v15 }
 0xef3   :  { %3325 = vtanh.f32 %v1634_v54  ;;  %v2622_v58 = vmul.f32 -1.442695, %v1634_v54 }
 0xef4   :  { %3327 = vpow2.f32 %v2620_v57 }
 0xef5   :  { %3329 = vpow2.f32 %v2622_v58 }
 0xef8   :  { %v3324_v55 = vpop.eup %3323 }
 0xef9   :  { %1546 = vrot.lane.b32.xlu0 %v3324_v55, %s3481_s12 }
 0xefd   :  { %v3326_v56 = vpop.eup %3325 }
 0xefe   :  { %1647 = vrot.lane.b32.xlu1 %v3326_v56, %s3481_s12  ;;  %v3328_v59 = vpop.eup %3327 }
 0xeff   :  { %v1540_v60 = vadd.f32 1.0, %v3328_v59  ;;  %v3330_v61 = vpop.eup %3329 }
 0xf00   :  { %v1638_v62 = vadd.f32 1.0, %v3330_v61 }
 0xf01   :  { %3331 = vrcp.f32 %v1540_v60 }
 0xf02   :  { %3333 = vrcp.f32 %v1638_v62 }
 0xf0b   :  { %v3332_v63 = vpop.eup %3331 }
 0xf0c   :  { %v3334_v4 = vpop.eup %3333  ;;  %v1544_v7 = vmul.f32 %v3332_v63, %v3833_v29 }
 0xf0d   :  { %v1645_v13 = vmul.f32 %v3334_v4, %v1643_v11 }
 0xf6b   :  { %v1547_v2 = vpop.permute.xlu0 %1546 }
 0xf6c   :  { %v1549_v3 = vmul.f32 %v3332_v63, %v1547_v2 }
 0xf6e   :  { %1551 = vrot.lane.b32.xlu0 %v1549_v3, %s3482_s2 }
 0xf70   :  { %v1648_v5 = vpop.permute.xlu1 %1647 }
 0xf71   :  { %v1650_v6 = vmul.f32 %v3334_v4, %v1648_v5 }
 0xf73   :  { %1652 = vrot.lane.b32.xlu1 %v1650_v6, %s3482_s2 }
 0xfe0   :  { %v1552_v8 = vpop.permute.xlu0 %1551 }
 0xfe1   :  { %v3871_v10 = vadd.f32 %v1552_v8, %v1544_v7 }
 0xfe3   :  { %3335 = vtanh.f32 %v3871_v10 }
 0xfe5   :  { %v1653_v14 = vpop.permute.xlu1 %1652 }
 0xfe6   :  { %v3875_v16 = vadd.f32 %v1653_v14, %v1645_v13 }
 0xfe8   :  { %3337 = vtanh.f32 %v3875_v16  ;;  %v1920_v55 = vrot.slane %v3875_v16, 6 }
 0xfed   :  { %v3336_v18 = vpop.eup %3335 }
 0xfee   :  { %1557 = vrot.lane.b32.xlu0 %v3336_v18, %s3481_s12 }
 0xff2   :  { %v3338_v19 = vpop.eup %3337 }
 0xff3   :  { %1658 = vrot.lane.b32.xlu1 %v3338_v19, %s3481_s12 }
0x1060   :  { %v1558_v20 = vpop.permute.xlu0 %1557 }
0x1061   :  { %v1560_v21 = vmul.f32 %v3332_v63, %v1558_v20 }
0x1063   :  { %1663 = vrot.lane.b32.xlu0 %v1560_v21, %s3482_s2 }
0x1065   :  { %v1659_v22 = vpop.permute.xlu1 %1658 }
0x1066   :  { %v1661_v23 = vmul.f32 %v3334_v4, %v1659_v22 }
0x1068   :  { %v1738_v24 = vrot.slane %v1661_v23, 2 }
0x106a   :  { %1739 = vrot.lane.b32.xlu1 %v1738_v24, %s3482_s2 }
0x10d5   :  { %v1664_v25 = vpop.permute.xlu0 %1663 }
0x10d6   :  { %2970 = vmatmul.mubr.msk.f32.vlgmr.msra.gmra.mrb[18].mxu1 %vm182_vm2, %v1664_v25 }
0x10d7   :  { %3191 = vmatpush3.bf16.msra.mxu1 %v3608_v9  ;;  %2991 = vmatprep.mubr.msk.f32.mxu1 %vm3479_vm0, %v3480_v1 }
0x10d8   :  { %3192 = vmatprep.subr.bf16.mxu1 %v3478_v0 }
0x10db   :  { %3194 = vmatpush3.bf16.msra.mxu1 %v3618_v12 }
0x10dc   :  { %v1740_v26 = vpop.permute.xlu1 %1739  ;;  %3201 = vmatprep.subr.bf16.mxu1 %v3478_v0 }
0x10dd   :  { %2981 = vmatmul.mubr.msk.f32.vlgmr.msra.gmra.mrb[16].mxu0 %vm182_vm2, %v1740_v26 }
0x10de   :  { %2992 = vmatmul.mubr.msk.f32.vlgmr.msra.gmra.mrb[20].mxu1 %vm182_vm2, %v1740_v26  ;;  %3197 = vmatpush3.bf16.msra.mxu0 %v3650_v34 }
0x10df   :  { %3198 = vmatprep.subr.bf16.mxu0 %v3478_v0  ;;  %3203 = vmatpush3.bf16.msra.mxu1 %v3661_v38 }
0x10e0   :  { %3002 = vmatprep.mubr.msk.f32.mxu0 %vm3479_vm0, %v3480_v1  ;;  %3204 = vmatprep.subr.bf16.mxu1 %v3478_v0 }
0x10e1   :  { %3013 = vmatprep.mubr.msk.f32.mxu1 %vm3479_vm0, %v3480_v1 }
0x10e2   :  { %3200 = vmatpush3.bf16.msra.mxu0 %v3670_v41 }
0x10e3   :  { %3207 = vmatprep.subr.bf16.mxu0 %v3478_v0  ;;  %3206 = vmatpush3.bf16.msra.mxu1 %v3674_v42 }
0x10e4   :  { %3213 = vmatprep.subr.bf16.mxu1 %v3478_v0 }
0x11a9   :  { %v1733_v27 = vpop.f32.mrb[18].mxu1 }
0x11aa   :  { %v2971_v28 = vpop.f32.mrb[19].mxu1 }
0x11b0   :  { %v1809_v29 = vpop.f32.mrb[16].mxu0 }
0x11b1   :  { %v1810_v30 = vadd.f32 %v1809_v29, %v1733_v27  ;;  %v2982_v31 = vpop.f32.mrb[17].mxu0  ;;  %v1904_v32 = vpop.f32.mrb[20].mxu1 }
0x11b2   :  { %v1909_v33 = vrot.slane %v1904_v32, 4  ;;  %v2993_v35 = vpop.f32.mrb[21].mxu1 }
0x11b3   :  { %v1813_v36 = vadd.f32 %v3707_v49, %v1810_v30 }
0x11b4   :  { %v1911_v17 = vadd.f32 %v1909_v33, %v3631_v15 }
0x11b5   :  { %3339 = vtanh.f32 %v1813_v36  ;;  %v2625_v40 = vmul.f32 -1.442695, %v1813_v36 }
0x11b6   :  { %3341 = vtanh.f32 %v1911_v17  ;;  %v2627_v43 = vmul.f32 -1.442695, %v1911_v17 }
0x11b7   :  { %3343 = vpow2.f32 %v2625_v40 }
0x11b8   :  { %3345 = vpow2.f32 %v2627_v43 }
0x11bf   :  { %v3340_v37 = vpop.eup %3339 }
0x11c0   :  { %v3342_v39 = vpop.eup %3341  ;;  %1823 = vrot.lane.b32.xlu0 %v3340_v37, %s3481_s12 }
0x11c1   :  { %1924 = vrot.lane.b32.xlu1 %v3342_v39, %s3481_s12  ;;  %v3344_v44 = vpop.eup %3343 }
0x11c2   :  { %v3346_v45 = vpop.eup %3345  ;;  %v1817_v46 = vadd.f32 1.0, %v3344_v44 }
0x11c3   :  { %v1915_v47 = vadd.f32 1.0, %v3346_v45 }
0x11c4   :  { %3347 = vrcp.f32 %v1817_v46 }
0x11c5   :  { %3349 = vrcp.f32 %v1915_v47 }
0x11ce   :  { %v3348_v48 = vpop.eup %3347 }
0x11cf   :  { %v3350_v51 = vpop.eup %3349  ;;  %v1821_v56 = vmul.f32 %v3348_v48, %v3871_v10 }
0x11d0   :  { %v1922_v58 = vmul.f32 %v3350_v51, %v1920_v55 }
0x1232   :  { %v1824_v50 = vpop.permute.xlu0 %1823 }
0x1233   :  { %v1826_v52 = vmul.f32 %v3348_v48, %v1824_v50  ;;  %v1925_v53 = vpop.permute.xlu1 %1924 }
0x1234   :  { %v1927_v54 = vmul.f32 %v3350_v51, %v1925_v53 }
0x1235   :  { %1828 = vrot.lane.b32.xlu0 %v1826_v52, %s3482_s2 }
0x1236   :  { %1929 = vrot.lane.b32.xlu1 %v1927_v54, %s3482_s2 }
0x12a7   :  { %v1829_v57 = vpop.permute.xlu0 %1828 }
0x12a8   :  { %v3911_v59 = vadd.f32 %v1829_v57, %v1821_v56  ;;  %v1930_v60 = vpop.permute.xlu1 %1929 }
0x12a9   :  { %v3913_v61 = vadd.f32 %v1930_v60, %v1922_v58 }
0x12aa   :  { %3351 = vtanh.f32 %v3911_v59 }
0x12ab   :  { %3353 = vtanh.f32 %v3913_v61  ;;  %v2197_v33 = vrot.slane %v3913_v61, 6 }
0x12b4   :  { %v3352_v62 = vpop.eup %3351 }
0x12b5   :  { %v3354_v63 = vpop.eup %3353  ;;  %1834 = vrot.lane.b32.xlu0 %v3352_v62, %s3481_s12 }
0x12b6   :  { %1935 = vrot.lane.b32.xlu1 %v3354_v63, %s3481_s12 }
0x1327   :  { %v1835_v2 = vpop.permute.xlu0 %1834 }
0x1328   :  { %v1837_v3 = vmul.f32 %v3348_v48, %v1835_v2  ;;  %v1936_v4 = vpop.permute.xlu1 %1935 }
0x1329   :  { %v1938_v5 = vmul.f32 %v3350_v51, %v1936_v4  ;;  %v2398_v4 = vld [vmem:[#allocation2] sm:$0xff] }
0x132a   :  { %1940 = vrot.lane.b32.xlu0 %v1837_v3, %s3482_s2 }
0x132b   :  { %v2015_v6 = vrot.slane %v1938_v5, 4  ;;  %v2400_v5 = vld [vmem:[#allocation2 + $0x10] sm:$0xff] }
0x132d   :  { %2016 = vrot.lane.b32.xlu1 %v2015_v6, %s3482_s2 }
0x139c   :  { %v1941_v7 = vpop.permute.xlu0 %1940 }
0x139d   :  { %3003 = vmatmul.mubr.msk.f32.vlgmr.msra.gmra.mrb[18].mxu0 %vm182_vm2, %v1941_v7  ;;  %v2401_v7 = vld [vmem:[#allocation2 + $0x18] sm:$0xff] }
0x139e   :  { %3209 = vmatpush3.bf16.msra.mxu0 %v3608_v9  ;;  %3024 = vmatprep.mubr.msk.f32.mxu0 %vm3479_vm0, %v3480_v1 }
0x139f   :  { %v2017_v8 = vpop.permute.xlu1 %2016  ;;  %3210 = vmatprep.subr.bf16.mxu0 %v3478_v0 }
0x13a0   :  { %3014 = vmatmul.mubr.msk.f32.vlgmr.msra.gmra.mrb[22].mxu1 %vm182_vm2, %v2017_v8 }
0x13a1   :  { %3215 = vmatpush3.bf16.msra.mxu1 %v3650_v34  ;;  %3035 = vmatprep.mubr.msk.f32.mxu1 %vm3479_vm0, %v3480_v1 }
0x13a2   :  { %3212 = vmatpush3.bf16.msra.mxu0 %v3618_v12  ;;  %3216 = vmatprep.subr.bf16.mxu1 %v3478_v0 }
0x13a3   :  { %3219 = vmatprep.subr.bf16.mxu0 %v3478_v0 }
0x13a5   :  { %3025 = vmatmul.mubr.msk.f32.vlgmr.msra.gmra.mrb[20].mxu0 %vm182_vm2, %v2017_v8  ;;  %3218 = vmatpush3.bf16.msra.mxu1 %v3670_v41  ;;  %v3229_v8 = vpack.c.bf16 %v2401_v7, %v2400_v5 }
0x13a6   :  { %3221 = vmatpush3.bf16.msra.mxu0 %v3661_v38  ;;  %3046 = vmatprep.mubr.msk.f32.mxu0 %vm3479_vm0, %v3480_v1 }
0x13a7   :  { %3222 = vmatprep.subr.bf16.mxu0 %v3478_v0  ;;  %3225 = vmatprep.subr.bf16.mxu1 %v3478_v0 }
0x13aa   :  { %3224 = vmatpush3.bf16.msra.mxu0 %v3674_v42 }
0x13ab   :  { %3231 = vmatprep.subr.bf16.mxu0 %v3478_v0 }
0x1470   :  { %v2010_v9 = vpop.f32.mrb[18].mxu0 }
0x1471   :  { %v3004_v12 = vpop.f32.mrb[19].mxu0 }
0x1472   :  { %v2485_v12 = vld [vmem:[%s4012_s9] sm:$0xff] }
0x1473   :  { %v2086_v34 = vpop.f32.mrb[22].mxu1 }
0x1474   :  { %v2087_v10 = vadd.f32 %v2086_v34, %v2010_v9  ;;  %v3015_v11 = vpop.f32.mrb[23].mxu1  ;;  %v2486_v34 = vld [vmem:[%s4012_s9 + $0x8] sm:$0xff] }
0x1475   :  { %v3232_v11 = vpack.c.bf16 %v2486_v34, %v2485_v12 }
0x1476   :  { %v2090_v41 = vadd.f32 %v3707_v49, %v2087_v10  ;;  %v2487_v10 = vld [vmem:[%s4012_s9 + $0x10] sm:$0xff] }
0x1478   :  { %3355 = vtanh.f32 %v2090_v41  ;;  %v2181_v38 = vpop.f32.mrb[20].mxu0  ;;  %v2630_v19 = vmul.f32 -1.442695, %v2090_v41  ;;  %v2488_v41 = vld [vmem:[%s4012_s9 + $0x18] sm:$0xff] }
0x1479   :  { %v2186_v13 = vrot.slane %v2181_v38, 2  ;;  %v3026_v14 = vpop.f32.mrb[21].mxu0  ;;  %v3235_v38 = vpack.c.bf16 %v2488_v41, %v2487_v10 }
0x147b   :  { %v2188_v16 = vadd.f32 %v2186_v13, %v3631_v15 }
0x147d   :  { %3357 = vtanh.f32 %v2188_v16  ;;  %v2632_v20 = vmul.f32 -1.442695, %v2188_v16 }
0x147e   :  { %3359 = vpow2.f32 %v2630_v19  ;;  %v2489_v19 = vld [vmem:[%s4012_s9 + $0x20] sm:$0xff] }
0x147f   :  { %3361 = vpow2.f32 %v2632_v20  ;;  %v2490_v20 = vld [vmem:[%s4012_s9 + $0x28] sm:$0xff] }
0x1482   :  { %v3356_v18 = vpop.eup %3355 }
0x1483   :  { %2100 = vrot.lane.b32.xlu1 %v3356_v18, %s3481_s12 }
0x1487   :  { %v3358_v42 = vpop.eup %3357 }
0x1488   :  { %2201 = vrot.lane.b32.xlu0 %v3358_v42, %s3481_s12  ;;  %v3360_v21 = vpop.eup %3359 }
0x1489   :  { %v2094_v22 = vadd.f32 1.0, %v3360_v21  ;;  %v3362_v23 = vpop.eup %3361  ;;  %v3238_v21 = vpack.c.bf16 %v2490_v20, %v2489_v19 }
0x148a   :  { %v2192_v24 = vadd.f32 1.0, %v3362_v23 }
0x148b   :  { %3363 = vrcp.f32 %v2094_v22  ;;  %v2636_v22 = vld [vmem:[#allocation5] ss:$0 sm:$0xff] }
0x148c   :  { %3365 = vrcp.f32 %v2192_v24 }
0x1495   :  { %v3364_v25 = vpop.eup %3363 }
0x1496   :  { %v3366_v27 = vpop.eup %3365  ;;  %v2098_v30 = vmul.f32 %v3364_v25, %v3911_v59 }
0x1497   :  { %v2199_v35 = vmul.f32 %v3366_v27, %v2197_v33 }
0x14f5   :  { %v2101_v26 = vpop.permute.xlu1 %2100 }
0x14f6   :  { %v2103_v15 = vmul.f32 %v3364_v25, %v2101_v26 }
0x14f8   :  { %2105 = vrot.lane.b32.xlu1 %v2103_v15, %s3482_s2  ;;  %v2638_v15 = vld [vmem:[#allocation7] ss:$0 sm:$0xff] }
0x14fa   :  { %v2202_v28 = vpop.permute.xlu0 %2201 }
0x14fb   :  { %v2204_v29 = vmul.f32 %v3366_v27, %v2202_v28 }
0x14fd   :  { %2206 = vrot.lane.b32.xlu0 %v2204_v29, %s3482_s2 }
0x156a   :  { %v2106_v31 = vpop.permute.xlu1 %2105 }
0x156b   :  { %v2108_v32 = vadd.f32 %v2106_v31, %v2098_v30 }
0x156d   :  { %3367 = vtanh.f32 %v2108_v32 }
0x156f   :  { %v2207_v36 = vpop.permute.xlu0 %2206 }
0x1570   :  { %v2209_v17 = vadd.f32 %v2207_v36, %v2199_v35 }
0x1572   :  { %3369 = vtanh.f32 %v2209_v17 }
0x1577   :  { %v3368_v37 = vpop.eup %3367 }
0x1578   :  { %2111 = vrot.lane.b32.xlu1 %v3368_v37, %s3481_s12 }
0x157c   :  { %v3370_v39 = vpop.eup %3369 }
0x157d   :  { %2212 = vrot.lane.b32.xlu0 %v3370_v39, %s3481_s12 }
0x15ea   :  { %v2112_v40 = vpop.permute.xlu1 %2111 }
0x15eb   :  { %v2114_v43 = vmul.f32 %v3364_v25, %v2112_v40 }
0x15ed   :  { %2217 = vrot.lane.b32.xlu0 %v2114_v43, %s3482_s2 }
0x15ef   :  { %v2213_v44 = vpop.permute.xlu0 %2212 }
0x15f0   :  { %v2215_v45 = vmul.f32 %v3366_v27, %v2213_v44 }
0x15f2   :  { %v2292_v46 = vrot.slane %v2215_v45, 6 }
0x15f4   :  { %2293 = vrot.lane.b32.xlu1 %v2292_v46, %s3482_s2 }
0x165f   :  { %v2218_v47 = vpop.permute.xlu0 %2217 }
0x1660   :  { %3036 = vmatmul.mubr.msk.f32.vlgmr.msra.gmra.mrb[24].mxu1 %vm182_vm2, %v2218_v47 }
0x1661   :  { %3057 = vmatprep.mubr.msk.f32.mxu1 %vm3479_vm0, %v3480_v1 }
0x1666   :  { %v2294_v48 = vpop.permute.xlu1 %2293 }
0x1667   :  { %3047 = vmatmul.mubr.msk.f32.vlgmr.msra.gmra.mrb[22].mxu0 %vm182_vm2, %v2294_v48 }
0x1668   :  { %3074 = vmatprep.mubr.msk.f32.mxu0 %vm3479_vm0, %v3480_v1  ;;  %3233 = vmatpush3.bf16.msra.mxu0 %v3232_v11 }
0x1669   :  { %3234 = vmatprep.subr.bf16.mxu0 %v3478_v0 }
0x166c   :  { %3236 = vmatpush3.bf16.msra.mxu0 %v3235_v38 }
0x166d   :  { %3237 = vmatprep.subr.bf16.mxu0 %v3478_v0 }
0x1670   :  { %3239 = vmatpush3.bf16.msra.mxu0 %v3238_v21 }
0x1671   :  { %3072 = vmatprep.subr.mxu0 %v3480_v1 }
0x1733   :  { %v2287_v50 = vpop.f32.mrb[24].mxu1 }
0x1734   :  { %v3037_v51 = vpop.f32.mrb[25].mxu1 }
0x173a   :  { %v2363_v52 = vpop.f32.mrb[22].mxu0 }
0x173b   :  { %v2364_v53 = vadd.f32 %v2363_v52, %v2287_v50  ;;  %v3048_v54 = vpop.f32.mrb[23].mxu0 }
0x173d   :  { %v2367_v55 = vadd.f32 %v3707_v49, %v2364_v53  ;;  %v2399_v49 = vld [vmem:[#allocation2 + $0x8] sm:$0xff] }
0x173e   :  { %v3226_v6 = vpack.c.bf16 %v2399_v49, %v2398_v4 }
0x173f   :  { %3371 = vtanh.f32 %v2367_v55  ;;  %v2635_v57 = vmul.f32 -1.442695, %v2367_v55 }
0x1740   :  { %3227 = vmatpush3.bf16.msra.mxu1 %v3226_v6 }
0x1741   :  { %3373 = vpow2.f32 %v2635_v57  ;;  %3228 = vmatprep.subr.bf16.mxu1 %v3478_v0  ;;  %v2491_v0 = vld [vmem:[%s4012_s9 + $0x30] sm:$0x3] }
0x1742   :  { %3073 = vmatpush3.msk.msra.mxu0 %vm2396_vm3, %v2491_v0 }
0x1744   :  { %3230 = vmatpush3.bf16.msra.mxu1 %v3229_v8 }
0x1749   :  { %v3372_v56 = vpop.eup %3371 }
0x174a   :  { %2377 = vrot.lane.b32.xlu0 %v3372_v56, %s3481_s12 }
0x174b   :  { %v3374_v58 = vpop.eup %3373 }
0x174c   :  { %v2371_v59 = vadd.f32 1.0, %v3374_v58 }
0x174e   :  { %3375 = vrcp.f32 %v2371_v59 }
0x1758   :  { %v3376_v60 = vpop.eup %3375 }
0x1759   :  { %v2375_v63 = vmul.f32 %v3376_v60, %v2108_v32 }
0x17bc   :  { %v2378_v61 = vpop.permute.xlu0 %2377 }
0x17bd   :  { %v2380_v62 = vmul.f32 %v3376_v60, %v2378_v61 }
0x17bf   :  { %2382 = vrot.lane.b32.xlu1 %v2380_v62, %s3482_s2 }
0x1831   :  { %v2383_v2 = vpop.permute.xlu1 %2382 }
0x1832   :  { %v2385_v3 = vadd.f32 %v2383_v2, %v2375_v63 }
0x1834   :  { %3377 = vtanh.f32 %v2385_v3 }
0x183e   :  { %v3378_v9 = vpop.eup %3377 }
0x183f   :  { %2388 = vrot.lane.b32.xlu0 %v3378_v9, %s3481_s12 }
0x18b1   :  { %v2389_v13 = vpop.permute.xlu0 %2388 }
0x18b2   :  { %v2391_v14 = vmul.f32 %v3376_v60, %v2389_v13 }
0x18b4   :  { %v2394_v16 = vrot.slane %v2391_v14, 6 }
0x18b6   :  { %v2397_v18 = vsel %vm2396_vm3, %v2292_v46, %v2394_v16 }
0x18b7   :  { %2410 = vrot.lane.b32.xlu1 %v2397_v18, %s3482_s2  ;;  %s3483_s2 = smov [#allocation8]  }
0x18b8   :  { %s2584_s20 = sshll.u32 %s3483_s2, 4  ;;  %s2585_s20 = int_to_ptr.vmem [resolvable:$true] %s2584_s20 }
0x18b9   :  { %s3445_s16 = scalar_lea.vmem %s2585_s20, 64  ;;  %p3450_p11 = scmp.lt.s32.totalorder %s2585_s20, %s2585_s20 }
0x18ba   :  { %p3446_p10 = scmp.ne.s32.totalorder %s2585_s20, %s3445_s16  ;;  %p3451_p12 = scmp.lt.s32.totalorder %s3445_s16, %s3445_s16 }
0x18bc   :  { %p3452_p13 = por %p3451_p12, %p3450_p11 }
0x18be   :  { %p3453_p0 = pnand %p3452_p13, %p3446_p10 }
0x1929   :  { %v2411_v42 = vpop.permute.xlu1 %2410 }
0x192a   :  { %3058 = vmatmul.mubr.msk.f32.vlgmr.msra.gmra.mrb[26].mxu1 %vm182_vm2, %v2411_v42 }
0x19fd   :  { %v2480_v23 = vpop.f32.mrb[26].mxu1 }
0x19fe   :  { %v2481_v24 = vadd.f32 %v2636_v22, %v2480_v23  ;;  %v3059_v25 = vpop.f32.mrb[27].mxu1 }
0x1a00   :  { %v2484_v26 = vmax.f32 %v2481_v24, 0.0 }
0x1a02   :  { %3075 = vmatmul.mubr.msk.f32.vlgmr.msra.gmra.mrb[24].mxu0 %vm2499_vm4, %v2484_v26 }
0x1ad5   :  { %v2572_v27 = vpop.f32.mrb[24].mxu0 }
0x1ad6   :  { %v2573_v28 = vadd.f32 %v2638_v15, %v2572_v27  ;;  %v3076_v29 = vpop.f32.mrb[25].mxu0 }
0x1ad8   :  { %2577 = vst.msk [vmem:[#allocation8] sm:$0xf] %vm2576_vm5, %v2573_v28 }
0x1ad9   :  { %3456 = shalt.err (!%p3453_p0)
}
0x1ada   :  { %s3457_s19 = scalar_lea.hbm %s4014_s11, 64 }
0x1adb   :  { %p3458_p1 = scmp.ne.s32.totalorder %s4014_s11, %s3457_s19  ;;  %p3461_p2 = scmp.lt.u32.totalorder %s3457_s19, %s4014_s11 }
0x1add   :  { %p3463_p3 = pnand %p3461_p2, %p3458_p1 }
0x1adf   :  { %3466 = shalt.err (!%p3463_p3)
}
0x1ae0   :  { %2587 = dma.vmem_to_hbm [thread:$0]  %s2585_s20, 64, %s4014_s11, [#allocation4]  }
0x1ae1   :  { %3471 = dma.done.wait [#allocation4], 64  }
0x1ae2   :  { %3472 = vsyncadd [#allocation4], 4294967232 }
0x1ae3   :  { %2591 = vsyncpa [#allocation3], 1 }
0x1ae4   :  { %2592 = vsyncpa [#allocation6], 1 }
0x1ae5   :  { %2593 = vsyncpa [#allocation4], 1 }

</bundles_post_ra>
